<compile_context>
chip_gen: v5e
topology: v5e:2x2
jax: 0.10.0
libtpu: 0.0.40
codegen_flags: <defaults>
</compile_context>

<pallas_src>
import functools

import jax
import jax.numpy as jnp
from jax import lax
from jax.experimental import pallas as pl
from jax.experimental.pallas import tpu as pltpu


def _sigmoid_via_tanh(x):
    # Mathematically identical to sigmoid; one EUP tanh instead of exp + recip.
    return 0.5 * (jnp.tanh(0.5 * x) + 1.0)


def _actor_kernel(x_ref, wih_ref, whh_ref, b_ref,
                  w1_ref, b1_ref, w2_ref, b2_ref, w3_ref, b3_ref,
                  out_ref, xg_scr, *, T, B_pad, H):
    # ---- Phase 1: input projection for all timesteps in one MXU matmul ----
    # x_ref: (T*B_pad, D) bf16, wih: (D, 4H) bf16, fused bias: (1, 4H) f32
    xg_scr[...] = (jnp.dot(x_ref[...], wih_ref[...],
                           preferred_element_type=jnp.float32)
                   + b_ref[...])

    # ---- Phase 2: sequential LSTM recurrence -------------------------------
    # whh_ref is read directly inside each dot (no 64-vreg hoist -> no spills);
    # fori_loop(unroll=True) bounds live ranges across the unrolled steps.
    def step(t, carry):
        h, c = carry
        row0 = pl.multiple_of(t * B_pad, B_pad)
        pre = xg_scr[pl.ds(row0, B_pad), :]                       # (B_pad, 4H)
        gates = pre + jnp.dot(h.astype(jnp.bfloat16), whh_ref[...],
                              preferred_element_type=jnp.float32)
        if_g = _sigmoid_via_tanh(gates[:, 0:2 * H])               # i | f fused
        i_g = if_g[:, 0:H]
        f_g = if_g[:, H:2 * H]
        g_g = jnp.tanh(gates[:, 2 * H:3 * H])
        o_g = _sigmoid_via_tanh(gates[:, 3 * H:4 * H])
        c_new = f_g * c + i_g * g_g
        h_new = o_g * jnp.tanh(c_new)
        return h_new, c_new

    h0 = jnp.zeros((B_pad, H), jnp.float32)
    h, _ = lax.fori_loop(0, T, step, (h0, h0), unroll=True)

    # ---- Phase 3: MLP head, all widths lane-padded (dense vregs / MXU) -----
    z1 = jnp.maximum(
        jnp.dot(h.astype(jnp.bfloat16), w1_ref[...],
                preferred_element_type=jnp.float32) + b1_ref[...], 0.0)
    z2 = jnp.maximum(
        jnp.dot(z1.astype(jnp.bfloat16), w2_ref[...],
                preferred_element_type=jnp.float32) + b2_ref[...], 0.0)
    out_ref[...] = (
        jnp.dot(z2.astype(jnp.bfloat16), w3_ref[...],
                preferred_element_type=jnp.float32)
        + b3_ref[...]).astype(out_ref.dtype)


def _pad2d(a, rows, cols):
    return jnp.pad(a, ((0, rows - a.shape[0]), (0, cols - a.shape[1])))


def actor_forward(state, params, num_stocks, num_actions):
    """state: (B, T, state_dim) float32 (batch_first, like PyTorch)."""
    B, T, D = state.shape
    H = params["whh_t"].shape[0]                 # 128 (LSTM hidden)
    HD = params["w1_t"].shape[1]                 # 64  (MLP hidden)
    out_dim = params["w3_t"].shape[1]            # num_stocks * num_actions

    B_pad = ((max(B, 8) + 7) // 8) * 8                       # sublane multiple
    HD_PAD = ((max(HD, 128) + 127) // 128) * 128             # lane-dense MLP
    OUT_PAD = ((max(out_dim, 128) + 127) // 128) * 128       # lane-dense out

    # time-major, batch-padded, flattened to 2D for the batched projection.
    # TODO(synk): fold this transpose/pad into the BlockSpec index_map (and add
    # a parallel batch grid axis) if B grows to hundreds/thousands of rows.
    x_tm = jnp.transpose(state, (1, 0, 2))                   # (T, B, D)
    x_tm = jnp.pad(x_tm, ((0, 0), (0, B_pad - B), (0, 0)))   # (T, B_pad, D)
    x2d = x_tm.reshape(T * B_pad, D).astype(jnp.bfloat16)

    bias = params["b_ih"] + params["b_hh"]                   # fused (1,4H) f32

    # bf16 matmul operands; zero-pad the 64-wide MLP to 128 lanes (exact).
    wih = params["wih_t"].astype(jnp.bfloat16)
    whh = params["whh_t"].astype(jnp.bfloat16)
    w1 = _pad2d(params["w1_t"], H, HD_PAD).astype(jnp.bfloat16)
    b1 = _pad2d(params["b1"], 1, HD_PAD)
    w2 = _pad2d(params["w2_t"], HD_PAD, HD_PAD).astype(jnp.bfloat16)
    b2 = _pad2d(params["b2"], 1, HD_PAD)
    w3 = _pad2d(params["w3_t"], HD_PAD, OUT_PAD).astype(jnp.bfloat16)
    b3 = _pad2d(params["b3"], 1, OUT_PAD)

    args = (x2d, wih, whh, bias, w1, b1, w2, b2, w3, b3)     # all 2D

    kernel = functools.partial(_actor_kernel, T=T, B_pad=B_pad, H=H)

    out_pad = pl.pallas_call(
        kernel,
        out_shape=jax.ShapeDtypeStruct((B_pad, OUT_PAD), jnp.float32),
        grid_spec=pltpu.PrefetchScalarGridSpec(
            num_scalar_prefetch=0,
            grid=(1,),
            in_specs=[pl.BlockSpec(a.shape, lambda i: (0, 0)) for a in args],
            out_specs=pl.BlockSpec((B_pad, OUT_PAD), lambda i: (0, 0)),
            scratch_shapes=[pltpu.VMEM((T * B_pad, 4 * H), jnp.float32)]),
        compiler_params=pltpu.CompilerParams(
            dimension_semantics=("arbitrary",),
            vmem_limit_bytes=32 * 1024 * 1024),
    )(*args)

    return out_pad[:B, :out_dim].reshape(B, num_stocks, num_actions)


def init_params(key, state_dim, num_stocks, num_actions):
    hidden_dim, hidden_dim2 = 64, 128
    out_dim = num_stocks * num_actions
    ks = jax.random.split(key, 10)

    def u(k, shape, fan_in):
        bound = 1.0 / jnp.sqrt(fan_in)
        return jax.random.uniform(k, shape, jnp.float32, -bound, bound)

    H = hidden_dim2
    return {
        # LSTM weights, pre-transposed: (in, 4H) / (H, 4H); gate order i,f,g,o
        "wih_t": u(ks[0], (state_dim, 4 * H), H),
        "whh_t": u(ks[1], (H, 4 * H), H),
        "b_ih":  u(ks[2], (1, 4 * H), H),
        "b_hh":  u(ks[3], (1, 4 * H), H),
        # MLP head, pre-transposed (unpadded f32 master copies)
        "w1_t": u(ks[4], (H, hidden_dim), H),
        "b1":   u(ks[5], (1, hidden_dim), H),
        "w2_t": u(ks[6], (hidden_dim, hidden_dim), hidden_dim),
        "b2":   u(ks[7], (1, hidden_dim), hidden_dim),
        "w3_t": u(ks[8], (hidden_dim, out_dim), hidden_dim),
        "b3":   u(ks[9], (1, out_dim), hidden_dim),
    }


def actor_reference(state, params, num_stocks, num_actions):
    """Pure-JAX f32 reference (lax.scan LSTM + MLP) for correctness checking."""
    B, T, D = state.shape
    H = params["whh_t"].shape[0]

    def step(carry, x_t):
        h, c = carry
        gates = (x_t @ params["wih_t"] + params["b_ih"]
                 + h @ params["whh_t"] + params["b_hh"])
        i = jax.nn.sigmoid(gates[:, 0 * H:1 * H])
        f = jax.nn.sigmoid(gates[:, 1 * H:2 * H])
        g = jnp.tanh(gates[:, 2 * H:3 * H])
        o = jax.nn.sigmoid(gates[:, 3 * H:4 * H])
        c = f * c + i * g
        h = o * jnp.tanh(c)
        return (h, c), None

    h0 = jnp.zeros((B, H), jnp.float32)
    (h, _), _ = jax.lax.scan(step, (h0, h0), jnp.transpose(state, (1, 0, 2)))
    z1 = jnp.maximum(h @ params["w1_t"] + params["b1"], 0.0)
    z2 = jnp.maximum(z1 @ params["w2_t"] + params["b2"], 0.0)
    out = z2 @ params["w3_t"] + params["b3"]
    return out.reshape(B, num_stocks, num_actions)


if __name__ == "__main__":
    B, T = 2, 8
    state_dim, num_stocks, num_actions = 32, 4, 3

    key = jax.random.PRNGKey(0)
    k_param, k_x = jax.random.split(key)
    params = init_params(k_param, state_dim, num_stocks, num_actions)
    state = jax.random.normal(k_x, (B, T, state_dim), jnp.float32)

    out = actor_forward(state, params, num_stocks, num_actions)
    out = jax.block_until_ready(out)

    ref = actor_reference(state, params, num_stocks, num_actions)
    assert out.shape == (B, num_stocks, num_actions)
    # Tolerance reflects bf16 MXU operands in the kernel vs f32 reference.
    err = float(jnp.max(jnp.abs(out - ref)))
    assert jnp.allclose(out, ref, atol=2e-2, rtol=2e-2), f"max abs err {err}"

    print("KERNEL_OK")
</pallas_src>

<mosaic_0001>
module attributes {stable_mosaic.version = 11 : i64} {
  func.func @_actor_kernel(%arg0: i32, %arg1: memref<64x32xbf16, #tpu.memory_space<vmem>>, %arg2: memref<32x512xbf16, #tpu.memory_space<vmem>>, %arg3: memref<128x512xbf16, #tpu.memory_space<vmem>>, %arg4: memref<1x512xf32, #tpu.memory_space<vmem>>, %arg5: memref<128x128xbf16, #tpu.memory_space<vmem>>, %arg6: memref<1x128xf32, #tpu.memory_space<vmem>>, %arg7: memref<128x128xbf16, #tpu.memory_space<vmem>>, %arg8: memref<1x128xf32, #tpu.memory_space<vmem>>, %arg9: memref<128x128xbf16, #tpu.memory_space<vmem>>, %arg10: memref<1x128xf32, #tpu.memory_space<vmem>>, %arg11: memref<8x128xf32, #tpu.memory_space<vmem>>, %arg12: memref<64x512xf32, #tpu.memory_space<vmem>>) attributes {dimension_semantics = [#tpu.dimension_semantics<arbitrary>], iteration_bounds = array<i64: 1>, scalar_prefetch = 0 : i64, scratch_operands = 1 : i64, tpu.core_type = #tpu.core_type<tc>, window_params = [{pipeline_mode = #tpu.pipeline_mode<synchronous>, transform_indices = @transform_0, window_bounds = array<i64: 64, 32>}, {pipeline_mode = #tpu.pipeline_mode<synchronous>, transform_indices = @transform_1, window_bounds = array<i64: 32, 512>}, {pipeline_mode = #tpu.pipeline_mode<synchronous>, transform_indices = @transform_2, window_bounds = array<i64: 128, 512>}, {pipeline_mode = #tpu.pipeline_mode<synchronous>, transform_indices = @transform_3, window_bounds = array<i64: 1, 512>}, {pipeline_mode = #tpu.pipeline_mode<synchronous>, transform_indices = @transform_4, window_bounds = array<i64: 128, 128>}, {pipeline_mode = #tpu.pipeline_mode<synchronous>, transform_indices = @transform_5, window_bounds = array<i64: 1, 128>}, {pipeline_mode = #tpu.pipeline_mode<synchronous>, transform_indices = @transform_6, window_bounds = array<i64: 128, 128>}, {pipeline_mode = #tpu.pipeline_mode<synchronous>, transform_indices = @transform_7, window_bounds = array<i64: 1, 128>}, {pipeline_mode = #tpu.pipeline_mode<synchronous>, transform_indices = @transform_8, window_bounds = array<i64: 128, 128>}, {pipeline_mode = #tpu.pipeline_mode<synchronous>, transform_indices = @transform_9, window_bounds = array<i64: 1, 128>}, {pipeline_mode = #tpu.pipeline_mode<synchronous>, transform_indices = @transform_10, window_bounds = array<i64: 8, 128>}]} {
    %c0 = arith.constant 0 : index
    %c0_0 = arith.constant 0 : index
    %0 = vector.load %arg1[%c0, %c0_0] : memref<64x32xbf16, #tpu.memory_space<vmem>>, vector<64x32xbf16>
    %c0_1 = arith.constant 0 : index
    %c0_2 = arith.constant 0 : index
    %1 = vector.load %arg2[%c0_1, %c0_2] : memref<32x512xbf16, #tpu.memory_space<vmem>>, vector<32x512xbf16>
    %cst = arith.constant dense<0.000000e+00> : vector<64x512xf32>
    %2 = tpu.matmul %0, %1, %cst {dimension_numbers = #tpu.dot_dimension_numbers<[1], [0], [0], [1], [0, 0, 1, 1], [], []>} : vector<64x32xbf16>, vector<32x512xbf16>, vector<64x512xf32> -> vector<64x512xf32>
    %c0_3 = arith.constant 0 : index
    %c0_4 = arith.constant 0 : index
    %3 = vector.load %arg4[%c0_3, %c0_4] : memref<1x512xf32, #tpu.memory_space<vmem>>, vector<1x512xf32>
    %4 = vector.broadcast %3 : vector<1x512xf32> to vector<64x512xf32>
    %5 = arith.addf %2, %4 : vector<64x512xf32>
    %c0_5 = arith.constant 0 : index
    %c0_6 = arith.constant 0 : index
    %6 = vector.load %arg12[%c0_5, %c0_6] : memref<64x512xf32, #tpu.memory_space<vmem>>, vector<64x512xf32>
    tpu.vector_store %arg12[%c0_5, %c0_6], %5 {strides = array<i32>} : memref<64x512xf32, #tpu.memory_space<vmem>>, vector<64x512xf32>,
    %cst_7 = arith.constant 0.000000e+00 : f32
    %7 = vector.broadcast %cst_7 : f32 to vector<8x128xf32>
    %c0_i32 = arith.constant 0 : i32
    %c8_i32 = arith.constant 8 : i32
    %8 = arith.muli %c0_i32, %c8_i32 : i32
    %9 = tpu.assume_multiple %8, 8 : i32
    %10 = arith.index_cast %9 : i32 to index
    %c0_8 = arith.constant 0 : index
    %11 = vector.load %arg12[%10, %c0_8] : memref<64x512xf32, #tpu.memory_space<vmem>>, vector<8x512xf32>
    %12 = arith.truncf %7 : vector<8x128xf32> to vector<8x128xbf16>
    %c0_9 = arith.constant 0 : index
    %c0_10 = arith.constant 0 : index
    %13 = vector.load %arg3[%c0_9, %c0_10] : memref<128x512xbf16, #tpu.memory_space<vmem>>, vector<128x512xbf16>
    %cst_11 = arith.constant dense<0.000000e+00> : vector<8x512xf32>
    %14 = tpu.matmul %12, %13, %cst_11 {dimension_numbers = #tpu.dot_dimension_numbers<[1], [0], [0], [1], [0, 0, 1, 1], [], []>} : vector<8x128xbf16>, vector<128x512xbf16>, vector<8x512xf32> -> vector<8x512xf32>
    %15 = arith.addf %11, %14 : vector<8x512xf32>
    %16 = vector.extract_strided_slice %15 {offsets = [0, 0], sizes = [8, 256], strides = [1, 1]} : vector<8x512xf32> to vector<8x256xf32>
    %cst_12 = arith.constant 5.000000e-01 : f32
    %17 = vector.broadcast %cst_12 : f32 to vector<8x256xf32>
    %18 = arith.mulf %17, %16 : vector<8x256xf32>
    %19 = math.tanh %18 : vector<8x256xf32>
    %cst_13 = arith.constant 1.000000e+00 : f32
    %20 = vector.broadcast %cst_13 : f32 to vector<8x256xf32>
    %21 = arith.addf %19, %20 : vector<8x256xf32>
    %cst_14 = arith.constant 5.000000e-01 : f32
    %22 = vector.broadcast %cst_14 : f32 to vector<8x256xf32>
    %23 = arith.mulf %22, %21 : vector<8x256xf32>
    %24 = vector.extract_strided_slice %23 {offsets = [0, 0], sizes = [8, 128], strides = [1, 1]} : vector<8x256xf32> to vector<8x128xf32>
    %25 = vector.extract_strided_slice %23 {offsets = [0, 128], sizes = [8, 128], strides = [1, 1]} : vector<8x256xf32> to vector<8x128xf32>
    %26 = vector.extract_strided_slice %15 {offsets = [0, 256], sizes = [8, 128], strides = [1, 1]} : vector<8x512xf32> to vector<8x128xf32>
    %27 = math.tanh %26 : vector<8x128xf32>
    %28 = vector.extract_strided_slice %15 {offsets = [0, 384], sizes = [8, 128], strides = [1, 1]} : vector<8x512xf32> to vector<8x128xf32>
    %cst_15 = arith.constant 5.000000e-01 : f32
    %29 = vector.broadcast %cst_15 : f32 to vector<8x128xf32>
    %30 = arith.mulf %29, %28 : vector<8x128xf32>
    %31 = math.tanh %30 : vector<8x128xf32>
    %cst_16 = arith.constant 1.000000e+00 : f32
    %32 = vector.broadcast %cst_16 : f32 to vector<8x128xf32>
    %33 = arith.addf %31, %32 : vector<8x128xf32>
    %cst_17 = arith.constant 5.000000e-01 : f32
    %34 = vector.broadcast %cst_17 : f32 to vector<8x128xf32>
    %35 = arith.mulf %34, %33 : vector<8x128xf32>
    %36 = arith.mulf %25, %7 : vector<8x128xf32>
    %37 = arith.mulf %24, %27 : vector<8x128xf32>
    %38 = arith.addf %36, %37 : vector<8x128xf32>
    %39 = math.tanh %38 : vector<8x128xf32>
    %40 = arith.mulf %35, %39 : vector<8x128xf32>
    %c1_i32 = arith.constant 1 : i32
    %c8_i32_18 = arith.constant 8 : i32
    %41 = arith.muli %c1_i32, %c8_i32_18 : i32
    %42 = tpu.assume_multiple %41, 8 : i32
    %43 = arith.index_cast %42 : i32 to index
    %c0_19 = arith.constant 0 : index
    %44 = vector.load %arg12[%43, %c0_19] : memref<64x512xf32, #tpu.memory_space<vmem>>, vector<8x512xf32>
    %45 = arith.truncf %40 : vector<8x128xf32> to vector<8x128xbf16>
    %c0_20 = arith.constant 0 : index
    %c0_21 = arith.constant 0 : index
    %46 = vector.load %arg3[%c0_20, %c0_21] : memref<128x512xbf16, #tpu.memory_space<vmem>>, vector<128x512xbf16>
    %cst_22 = arith.constant dense<0.000000e+00> : vector<8x512xf32>
    %47 = tpu.matmul %45, %46, %cst_22 {dimension_numbers = #tpu.dot_dimension_numbers<[1], [0], [0], [1], [0, 0, 1, 1], [], []>} : vector<8x128xbf16>, vector<128x512xbf16>, vector<8x512xf32> -> vector<8x512xf32>
    %48 = arith.addf %44, %47 : vector<8x512xf32>
    %49 = vector.extract_strided_slice %48 {offsets = [0, 0], sizes = [8, 256], strides = [1, 1]} : vector<8x512xf32> to vector<8x256xf32>
    %cst_23 = arith.constant 5.000000e-01 : f32
    %50 = vector.broadcast %cst_23 : f32 to vector<8x256xf32>
    %51 = arith.mulf %50, %49 : vector<8x256xf32>
    %52 = math.tanh %51 : vector<8x256xf32>
    %cst_24 = arith.constant 1.000000e+00 : f32
    %53 = vector.broadcast %cst_24 : f32 to vector<8x256xf32>
    %54 = arith.addf %52, %53 : vector<8x256xf32>
    %cst_25 = arith.constant 5.000000e-01 : f32
    %55 = vector.broadcast %cst_25 : f32 to vector<8x256xf32>
    %56 = arith.mulf %55, %54 : vector<8x256xf32>
    %57 = vector.extract_strided_slice %56 {offsets = [0, 0], sizes = [8, 128], strides = [1, 1]} : vector<8x256xf32> to vector<8x128xf32>
    %58 = vector.extract_strided_slice %56 {offsets = [0, 128], sizes = [8, 128], strides = [1, 1]} : vector<8x256xf32> to vector<8x128xf32>
    %59 = vector.extract_strided_slice %48 {offsets = [0, 256], sizes = [8, 128], strides = [1, 1]} : vector<8x512xf32> to vector<8x128xf32>
    %60 = math.tanh %59 : vector<8x128xf32>
    %61 = vector.extract_strided_slice %48 {offsets = [0, 384], sizes = [8, 128], strides = [1, 1]} : vector<8x512xf32> to vector<8x128xf32>
    %cst_26 = arith.constant 5.000000e-01 : f32
    %62 = vector.broadcast %cst_26 : f32 to vector<8x128xf32>
    %63 = arith.mulf %62, %61 : vector<8x128xf32>
    %64 = math.tanh %63 : vector<8x128xf32>
    %cst_27 = arith.constant 1.000000e+00 : f32
    %65 = vector.broadcast %cst_27 : f32 to vector<8x128xf32>
    %66 = arith.addf %64, %65 : vector<8x128xf32>
    %cst_28 = arith.constant 5.000000e-01 : f32
    %67 = vector.broadcast %cst_28 : f32 to vector<8x128xf32>
    %68 = arith.mulf %67, %66 : vector<8x128xf32>
    %69 = arith.mulf %58, %38 : vector<8x128xf32>
    %70 = arith.mulf %57, %60 : vector<8x128xf32>
    %71 = arith.addf %69, %70 : vector<8x128xf32>
    %72 = math.tanh %71 : vector<8x128xf32>
    %73 = arith.mulf %68, %72 : vector<8x128xf32>
    %c2_i32 = arith.constant 2 : i32
    %c8_i32_29 = arith.constant 8 : i32
    %74 = arith.muli %c2_i32, %c8_i32_29 : i32
    %75 = tpu.assume_multiple %74, 8 : i32
    %76 = arith.index_cast %75 : i32 to index
    %c0_30 = arith.constant 0 : index
    %77 = vector.load %arg12[%76, %c0_30] : memref<64x512xf32, #tpu.memory_space<vmem>>, vector<8x512xf32>
    %78 = arith.truncf %73 : vector<8x128xf32> to vector<8x128xbf16>
    %c0_31 = arith.constant 0 : index
    %c0_32 = arith.constant 0 : index
    %79 = vector.load %arg3[%c0_31, %c0_32] : memref<128x512xbf16, #tpu.memory_space<vmem>>, vector<128x512xbf16>
    %cst_33 = arith.constant dense<0.000000e+00> : vector<8x512xf32>
    %80 = tpu.matmul %78, %79, %cst_33 {dimension_numbers = #tpu.dot_dimension_numbers<[1], [0], [0], [1], [0, 0, 1, 1], [], []>} : vector<8x128xbf16>, vector<128x512xbf16>, vector<8x512xf32> -> vector<8x512xf32>
    %81 = arith.addf %77, %80 : vector<8x512xf32>
    %82 = vector.extract_strided_slice %81 {offsets = [0, 0], sizes = [8, 256], strides = [1, 1]} : vector<8x512xf32> to vector<8x256xf32>
    %cst_34 = arith.constant 5.000000e-01 : f32
    %83 = vector.broadcast %cst_34 : f32 to vector<8x256xf32>
    %84 = arith.mulf %83, %82 : vector<8x256xf32>
    %85 = math.tanh %84 : vector<8x256xf32>
    %cst_35 = arith.constant 1.000000e+00 : f32
    %86 = vector.broadcast %cst_35 : f32 to vector<8x256xf32>
    %87 = arith.addf %85, %86 : vector<8x256xf32>
    %cst_36 = arith.constant 5.000000e-01 : f32
    %88 = vector.broadcast %cst_36 : f32 to vector<8x256xf32>
    %89 = arith.mulf %88, %87 : vector<8x256xf32>
    %90 = vector.extract_strided_slice %89 {offsets = [0, 0], sizes = [8, 128], strides = [1, 1]} : vector<8x256xf32> to vector<8x128xf32>
    %91 = vector.extract_strided_slice %89 {offsets = [0, 128], sizes = [8, 128], strides = [1, 1]} : vector<8x256xf32> to vector<8x128xf32>
    %92 = vector.extract_strided_slice %81 {offsets = [0, 256], sizes = [8, 128], strides = [1, 1]} : vector<8x512xf32> to vector<8x128xf32>
    %93 = math.tanh %92 : vector<8x128xf32>
    %94 = vector.extract_strided_slice %81 {offsets = [0, 384], sizes = [8, 128], strides = [1, 1]} : vector<8x512xf32> to vector<8x128xf32>
    %cst_37 = arith.constant 5.000000e-01 : f32
    %95 = vector.broadcast %cst_37 : f32 to vector<8x128xf32>
    %96 = arith.mulf %95, %94 : vector<8x128xf32>
    %97 = math.tanh %96 : vector<8x128xf32>
    %cst_38 = arith.constant 1.000000e+00 : f32
    %98 = vector.broadcast %cst_38 : f32 to vector<8x128xf32>
    %99 = arith.addf %97, %98 : vector<8x128xf32>
    %cst_39 = arith.constant 5.000000e-01 : f32
    %100 = vector.broadcast %cst_39 : f32 to vector<8x128xf32>
    %101 = arith.mulf %100, %99 : vector<8x128xf32>
    %102 = arith.mulf %91, %71 : vector<8x128xf32>
    %103 = arith.mulf %90, %93 : vector<8x128xf32>
    %104 = arith.addf %102, %103 : vector<8x128xf32>
    %105 = math.tanh %104 : vector<8x128xf32>
    %106 = arith.mulf %101, %105 : vector<8x128xf32>
    %c3_i32 = arith.constant 3 : i32
    %c8_i32_40 = arith.constant 8 : i32
    %107 = arith.muli %c3_i32, %c8_i32_40 : i32
    %108 = tpu.assume_multiple %107, 8 : i32
    %109 = arith.index_cast %108 : i32 to index
    %c0_41 = arith.constant 0 : index
    %110 = vector.load %arg12[%109, %c0_41] : memref<64x512xf32, #tpu.memory_space<vmem>>, vector<8x512xf32>
    %111 = arith.truncf %106 : vector<8x128xf32> to vector<8x128xbf16>
    %c0_42 = arith.constant 0 : index
    %c0_43 = arith.constant 0 : index
    %112 = vector.load %arg3[%c0_42, %c0_43] : memref<128x512xbf16, #tpu.memory_space<vmem>>, vector<128x512xbf16>
    %cst_44 = arith.constant dense<0.000000e+00> : vector<8x512xf32>
    %113 = tpu.matmul %111, %112, %cst_44 {dimension_numbers = #tpu.dot_dimension_numbers<[1], [0], [0], [1], [0, 0, 1, 1], [], []>} : vector<8x128xbf16>, vector<128x512xbf16>, vector<8x512xf32> -> vector<8x512xf32>
    %114 = arith.addf %110, %113 : vector<8x512xf32>
    %115 = vector.extract_strided_slice %114 {offsets = [0, 0], sizes = [8, 256], strides = [1, 1]} : vector<8x512xf32> to vector<8x256xf32>
    %cst_45 = arith.constant 5.000000e-01 : f32
    %116 = vector.broadcast %cst_45 : f32 to vector<8x256xf32>
    %117 = arith.mulf %116, %115 : vector<8x256xf32>
    %118 = math.tanh %117 : vector<8x256xf32>
    %cst_46 = arith.constant 1.000000e+00 : f32
    %119 = vector.broadcast %cst_46 : f32 to vector<8x256xf32>
    %120 = arith.addf %118, %119 : vector<8x256xf32>
    %cst_47 = arith.constant 5.000000e-01 : f32
    %121 = vector.broadcast %cst_47 : f32 to vector<8x256xf32>
    %122 = arith.mulf %121, %120 : vector<8x256xf32>
    %123 = vector.extract_strided_slice %122 {offsets = [0, 0], sizes = [8, 128], strides = [1, 1]} : vector<8x256xf32> to vector<8x128xf32>
    %124 = vector.extract_strided_slice %122 {offsets = [0, 128], sizes = [8, 128], strides = [1, 1]} : vector<8x256xf32> to vector<8x128xf32>
    %125 = vector.extract_strided_slice %114 {offsets = [0, 256], sizes = [8, 128], strides = [1, 1]} : vector<8x512xf32> to vector<8x128xf32>
    %126 = math.tanh %125 : vector<8x128xf32>
    %127 = vector.extract_strided_slice %114 {offsets = [0, 384], sizes = [8, 128], strides = [1, 1]} : vector<8x512xf32> to vector<8x128xf32>
    %cst_48 = arith.constant 5.000000e-01 : f32
    %128 = vector.broadcast %cst_48 : f32 to vector<8x128xf32>
    %129 = arith.mulf %128, %127 : vector<8x128xf32>
    %130 = math.tanh %129 : vector<8x128xf32>
    %cst_49 = arith.constant 1.000000e+00 : f32
    %131 = vector.broadcast %cst_49 : f32 to vector<8x128xf32>
    %132 = arith.addf %130, %131 : vector<8x128xf32>
    %cst_50 = arith.constant 5.000000e-01 : f32
    %133 = vector.broadcast %cst_50 : f32 to vector<8x128xf32>
    %134 = arith.mulf %133, %132 : vector<8x128xf32>
    %135 = arith.mulf %124, %104 : vector<8x128xf32>
    %136 = arith.mulf %123, %126 : vector<8x128xf32>
    %137 = arith.addf %135, %136 : vector<8x128xf32>
    %138 = math.tanh %137 : vector<8x128xf32>
    %139 = arith.mulf %134, %138 : vector<8x128xf32>
    %c4_i32 = arith.constant 4 : i32
    %c8_i32_51 = arith.constant 8 : i32
    %140 = arith.muli %c4_i32, %c8_i32_51 : i32
    %141 = tpu.assume_multiple %140, 8 : i32
    %142 = arith.index_cast %141 : i32 to index
    %c0_52 = arith.constant 0 : index
    %143 = vector.load %arg12[%142, %c0_52] : memref<64x512xf32, #tpu.memory_space<vmem>>, vector<8x512xf32>
    %144 = arith.truncf %139 : vector<8x128xf32> to vector<8x128xbf16>
    %c0_53 = arith.constant 0 : index
    %c0_54 = arith.constant 0 : index
    %145 = vector.load %arg3[%c0_53, %c0_54] : memref<128x512xbf16, #tpu.memory_space<vmem>>, vector<128x512xbf16>
    %cst_55 = arith.constant dense<0.000000e+00> : vector<8x512xf32>
    %146 = tpu.matmul %144, %145, %cst_55 {dimension_numbers = #tpu.dot_dimension_numbers<[1], [0], [0], [1], [0, 0, 1, 1], [], []>} : vector<8x128xbf16>, vector<128x512xbf16>, vector<8x512xf32> -> vector<8x512xf32>
    %147 = arith.addf %143, %146 : vector<8x512xf32>
    %148 = vector.extract_strided_slice %147 {offsets = [0, 0], sizes = [8, 256], strides = [1, 1]} : vector<8x512xf32> to vector<8x256xf32>
    %cst_56 = arith.constant 5.000000e-01 : f32
    %149 = vector.broadcast %cst_56 : f32 to vector<8x256xf32>
    %150 = arith.mulf %149, %148 : vector<8x256xf32>
    %151 = math.tanh %150 : vector<8x256xf32>
    %cst_57 = arith.constant 1.000000e+00 : f32
    %152 = vector.broadcast %cst_57 : f32 to vector<8x256xf32>
    %153 = arith.addf %151, %152 : vector<8x256xf32>
    %cst_58 = arith.constant 5.000000e-01 : f32
    %154 = vector.broadcast %cst_58 : f32 to vector<8x256xf32>
    %155 = arith.mulf %154, %153 : vector<8x256xf32>
    %156 = vector.extract_strided_slice %155 {offsets = [0, 0], sizes = [8, 128], strides = [1, 1]} : vector<8x256xf32> to vector<8x128xf32>
    %157 = vector.extract_strided_slice %155 {offsets = [0, 128], sizes = [8, 128], strides = [1, 1]} : vector<8x256xf32> to vector<8x128xf32>
    %158 = vector.extract_strided_slice %147 {offsets = [0, 256], sizes = [8, 128], strides = [1, 1]} : vector<8x512xf32> to vector<8x128xf32>
    %159 = math.tanh %158 : vector<8x128xf32>
    %160 = vector.extract_strided_slice %147 {offsets = [0, 384], sizes = [8, 128], strides = [1, 1]} : vector<8x512xf32> to vector<8x128xf32>
    %cst_59 = arith.constant 5.000000e-01 : f32
    %161 = vector.broadcast %cst_59 : f32 to vector<8x128xf32>
    %162 = arith.mulf %161, %160 : vector<8x128xf32>
    %163 = math.tanh %162 : vector<8x128xf32>
    %cst_60 = arith.constant 1.000000e+00 : f32
    %164 = vector.broadcast %cst_60 : f32 to vector<8x128xf32>
    %165 = arith.addf %163, %164 : vector<8x128xf32>
    %cst_61 = arith.constant 5.000000e-01 : f32
    %166 = vector.broadcast %cst_61 : f32 to vector<8x128xf32>
    %167 = arith.mulf %166, %165 : vector<8x128xf32>
    %168 = arith.mulf %157, %137 : vector<8x128xf32>
    %169 = arith.mulf %156, %159 : vector<8x128xf32>
    %170 = arith.addf %168, %169 : vector<8x128xf32>
    %171 = math.tanh %170 : vector<8x128xf32>
    %172 = arith.mulf %167, %171 : vector<8x128xf32>
    %c5_i32 = arith.constant 5 : i32
    %c8_i32_62 = arith.constant 8 : i32
    %173 = arith.muli %c5_i32, %c8_i32_62 : i32
    %174 = tpu.assume_multiple %173, 8 : i32
    %175 = arith.index_cast %174 : i32 to index
    %c0_63 = arith.constant 0 : index
    %176 = vector.load %arg12[%175, %c0_63] : memref<64x512xf32, #tpu.memory_space<vmem>>, vector<8x512xf32>
    %177 = arith.truncf %172 : vector<8x128xf32> to vector<8x128xbf16>
    %c0_64 = arith.constant 0 : index
    %c0_65 = arith.constant 0 : index
    %178 = vector.load %arg3[%c0_64, %c0_65] : memref<128x512xbf16, #tpu.memory_space<vmem>>, vector<128x512xbf16>
    %cst_66 = arith.constant dense<0.000000e+00> : vector<8x512xf32>
    %179 = tpu.matmul %177, %178, %cst_66 {dimension_numbers = #tpu.dot_dimension_numbers<[1], [0], [0], [1], [0, 0, 1, 1], [], []>} : vector<8x128xbf16>, vector<128x512xbf16>, vector<8x512xf32> -> vector<8x512xf32>
    %180 = arith.addf %176, %179 : vector<8x512xf32>
    %181 = vector.extract_strided_slice %180 {offsets = [0, 0], sizes = [8, 256], strides = [1, 1]} : vector<8x512xf32> to vector<8x256xf32>
    %cst_67 = arith.constant 5.000000e-01 : f32
    %182 = vector.broadcast %cst_67 : f32 to vector<8x256xf32>
    %183 = arith.mulf %182, %181 : vector<8x256xf32>
    %184 = math.tanh %183 : vector<8x256xf32>
    %cst_68 = arith.constant 1.000000e+00 : f32
    %185 = vector.broadcast %cst_68 : f32 to vector<8x256xf32>
    %186 = arith.addf %184, %185 : vector<8x256xf32>
    %cst_69 = arith.constant 5.000000e-01 : f32
    %187 = vector.broadcast %cst_69 : f32 to vector<8x256xf32>
    %188 = arith.mulf %187, %186 : vector<8x256xf32>
    %189 = vector.extract_strided_slice %188 {offsets = [0, 0], sizes = [8, 128], strides = [1, 1]} : vector<8x256xf32> to vector<8x128xf32>
    %190 = vector.extract_strided_slice %188 {offsets = [0, 128], sizes = [8, 128], strides = [1, 1]} : vector<8x256xf32> to vector<8x128xf32>
    %191 = vector.extract_strided_slice %180 {offsets = [0, 256], sizes = [8, 128], strides = [1, 1]} : vector<8x512xf32> to vector<8x128xf32>
    %192 = math.tanh %191 : vector<8x128xf32>
    %193 = vector.extract_strided_slice %180 {offsets = [0, 384], sizes = [8, 128], strides = [1, 1]} : vector<8x512xf32> to vector<8x128xf32>
    %cst_70 = arith.constant 5.000000e-01 : f32
    %194 = vector.broadcast %cst_70 : f32 to vector<8x128xf32>
    %195 = arith.mulf %194, %193 : vector<8x128xf32>
    %196 = math.tanh %195 : vector<8x128xf32>
    %cst_71 = arith.constant 1.000000e+00 : f32
    %197 = vector.broadcast %cst_71 : f32 to vector<8x128xf32>
    %198 = arith.addf %196, %197 : vector<8x128xf32>
    %cst_72 = arith.constant 5.000000e-01 : f32
    %199 = vector.broadcast %cst_72 : f32 to vector<8x128xf32>
    %200 = arith.mulf %199, %198 : vector<8x128xf32>
    %201 = arith.mulf %190, %170 : vector<8x128xf32>
    %202 = arith.mulf %189, %192 : vector<8x128xf32>
    %203 = arith.addf %201, %202 : vector<8x128xf32>
    %204 = math.tanh %203 : vector<8x128xf32>
    %205 = arith.mulf %200, %204 : vector<8x128xf32>
    %c6_i32 = arith.constant 6 : i32
    %c8_i32_73 = arith.constant 8 : i32
    %206 = arith.muli %c6_i32, %c8_i32_73 : i32
    %207 = tpu.assume_multiple %206, 8 : i32
    %208 = arith.index_cast %207 : i32 to index
    %c0_74 = arith.constant 0 : index
    %209 = vector.load %arg12[%208, %c0_74] : memref<64x512xf32, #tpu.memory_space<vmem>>, vector<8x512xf32>
    %210 = arith.truncf %205 : vector<8x128xf32> to vector<8x128xbf16>
    %c0_75 = arith.constant 0 : index
    %c0_76 = arith.constant 0 : index
    %211 = vector.load %arg3[%c0_75, %c0_76] : memref<128x512xbf16, #tpu.memory_space<vmem>>, vector<128x512xbf16>
    %cst_77 = arith.constant dense<0.000000e+00> : vector<8x512xf32>
    %212 = tpu.matmul %210, %211, %cst_77 {dimension_numbers = #tpu.dot_dimension_numbers<[1], [0], [0], [1], [0, 0, 1, 1], [], []>} : vector<8x128xbf16>, vector<128x512xbf16>, vector<8x512xf32> -> vector<8x512xf32>
    %213 = arith.addf %209, %212 : vector<8x512xf32>
    %214 = vector.extract_strided_slice %213 {offsets = [0, 0], sizes = [8, 256], strides = [1, 1]} : vector<8x512xf32> to vector<8x256xf32>
    %cst_78 = arith.constant 5.000000e-01 : f32
    %215 = vector.broadcast %cst_78 : f32 to vector<8x256xf32>
    %216 = arith.mulf %215, %214 : vector<8x256xf32>
    %217 = math.tanh %216 : vector<8x256xf32>
    %cst_79 = arith.constant 1.000000e+00 : f32
    %218 = vector.broadcast %cst_79 : f32 to vector<8x256xf32>
    %219 = arith.addf %217, %218 : vector<8x256xf32>
    %cst_80 = arith.constant 5.000000e-01 : f32
    %220 = vector.broadcast %cst_80 : f32 to vector<8x256xf32>
    %221 = arith.mulf %220, %219 : vector<8x256xf32>
    %222 = vector.extract_strided_slice %221 {offsets = [0, 0], sizes = [8, 128], strides = [1, 1]} : vector<8x256xf32> to vector<8x128xf32>
    %223 = vector.extract_strided_slice %221 {offsets = [0, 128], sizes = [8, 128], strides = [1, 1]} : vector<8x256xf32> to vector<8x128xf32>
    %224 = vector.extract_strided_slice %213 {offsets = [0, 256], sizes = [8, 128], strides = [1, 1]} : vector<8x512xf32> to vector<8x128xf32>
    %225 = math.tanh %224 : vector<8x128xf32>
    %226 = vector.extract_strided_slice %213 {offsets = [0, 384], sizes = [8, 128], strides = [1, 1]} : vector<8x512xf32> to vector<8x128xf32>
    %cst_81 = arith.constant 5.000000e-01 : f32
    %227 = vector.broadcast %cst_81 : f32 to vector<8x128xf32>
    %228 = arith.mulf %227, %226 : vector<8x128xf32>
    %229 = math.tanh %228 : vector<8x128xf32>
    %cst_82 = arith.constant 1.000000e+00 : f32
    %230 = vector.broadcast %cst_82 : f32 to vector<8x128xf32>
    %231 = arith.addf %229, %230 : vector<8x128xf32>
    %cst_83 = arith.constant 5.000000e-01 : f32
    %232 = vector.broadcast %cst_83 : f32 to vector<8x128xf32>
    %233 = arith.mulf %232, %231 : vector<8x128xf32>
    %234 = arith.mulf %223, %203 : vector<8x128xf32>
    %235 = arith.mulf %222, %225 : vector<8x128xf32>
    %236 = arith.addf %234, %235 : vector<8x128xf32>
    %237 = math.tanh %236 : vector<8x128xf32>
    %238 = arith.mulf %233, %237 : vector<8x128xf32>
    %c7_i32 = arith.constant 7 : i32
    %c8_i32_84 = arith.constant 8 : i32
    %239 = arith.muli %c7_i32, %c8_i32_84 : i32
    %240 = tpu.assume_multiple %239, 8 : i32
    %241 = arith.index_cast %240 : i32 to index
    %c0_85 = arith.constant 0 : index
    %242 = vector.load %arg12[%241, %c0_85] : memref<64x512xf32, #tpu.memory_space<vmem>>, vector<8x512xf32>
    %243 = arith.truncf %238 : vector<8x128xf32> to vector<8x128xbf16>
    %c0_86 = arith.constant 0 : index
    %c0_87 = arith.constant 0 : index
    %244 = vector.load %arg3[%c0_86, %c0_87] : memref<128x512xbf16, #tpu.memory_space<vmem>>, vector<128x512xbf16>
    %cst_88 = arith.constant dense<0.000000e+00> : vector<8x512xf32>
    %245 = tpu.matmul %243, %244, %cst_88 {dimension_numbers = #tpu.dot_dimension_numbers<[1], [0], [0], [1], [0, 0, 1, 1], [], []>} : vector<8x128xbf16>, vector<128x512xbf16>, vector<8x512xf32> -> vector<8x512xf32>
    %246 = arith.addf %242, %245 : vector<8x512xf32>
    %247 = vector.extract_strided_slice %246 {offsets = [0, 0], sizes = [8, 256], strides = [1, 1]} : vector<8x512xf32> to vector<8x256xf32>
    %cst_89 = arith.constant 5.000000e-01 : f32
    %248 = vector.broadcast %cst_89 : f32 to vector<8x256xf32>
    %249 = arith.mulf %248, %247 : vector<8x256xf32>
    %250 = math.tanh %249 : vector<8x256xf32>
    %cst_90 = arith.constant 1.000000e+00 : f32
    %251 = vector.broadcast %cst_90 : f32 to vector<8x256xf32>
    %252 = arith.addf %250, %251 : vector<8x256xf32>
    %cst_91 = arith.constant 5.000000e-01 : f32
    %253 = vector.broadcast %cst_91 : f32 to vector<8x256xf32>
    %254 = arith.mulf %253, %252 : vector<8x256xf32>
    %255 = vector.extract_strided_slice %254 {offsets = [0, 0], sizes = [8, 128], strides = [1, 1]} : vector<8x256xf32> to vector<8x128xf32>
    %256 = vector.extract_strided_slice %254 {offsets = [0, 128], sizes = [8, 128], strides = [1, 1]} : vector<8x256xf32> to vector<8x128xf32>
    %257 = vector.extract_strided_slice %246 {offsets = [0, 256], sizes = [8, 128], strides = [1, 1]} : vector<8x512xf32> to vector<8x128xf32>
    %258 = math.tanh %257 : vector<8x128xf32>
    %259 = vector.extract_strided_slice %246 {offsets = [0, 384], sizes = [8, 128], strides = [1, 1]} : vector<8x512xf32> to vector<8x128xf32>
    %cst_92 = arith.constant 5.000000e-01 : f32
    %260 = vector.broadcast %cst_92 : f32 to vector<8x128xf32>
    %261 = arith.mulf %260, %259 : vector<8x128xf32>
    %262 = math.tanh %261 : vector<8x128xf32>
    %cst_93 = arith.constant 1.000000e+00 : f32
    %263 = vector.broadcast %cst_93 : f32 to vector<8x128xf32>
    %264 = arith.addf %262, %263 : vector<8x128xf32>
    %cst_94 = arith.constant 5.000000e-01 : f32
    %265 = vector.broadcast %cst_94 : f32 to vector<8x128xf32>
    %266 = arith.mulf %265, %264 : vector<8x128xf32>
    %267 = arith.mulf %256, %236 : vector<8x128xf32>
    %268 = arith.mulf %255, %258 : vector<8x128xf32>
    %269 = arith.addf %267, %268 : vector<8x128xf32>
    %270 = math.tanh %269 : vector<8x128xf32>
    %271 = arith.mulf %266, %270 : vector<8x128xf32>
    %c8_i32_95 = arith.constant 8 : i32
    %272 = arith.truncf %271 : vector<8x128xf32> to vector<8x128xbf16>
    %c0_96 = arith.constant 0 : index
    %c0_97 = arith.constant 0 : index
    %273 = vector.load %arg5[%c0_96, %c0_97] : memref<128x128xbf16, #tpu.memory_space<vmem>>, vector<128x128xbf16>
    %cst_98 = arith.constant dense<0.000000e+00> : vector<8x128xf32>
    %274 = tpu.matmul %272, %273, %cst_98 {dimension_numbers = #tpu.dot_dimension_numbers<[1], [0], [0], [1], [0, 0, 1, 1], [], []>} : vector<8x128xbf16>, vector<128x128xbf16>, vector<8x128xf32> -> vector<8x128xf32>
    %c0_99 = arith.constant 0 : index
    %c0_100 = arith.constant 0 : index
    %275 = vector.load %arg6[%c0_99, %c0_100] : memref<1x128xf32, #tpu.memory_space<vmem>>, vector<1x128xf32>
    %276 = vector.broadcast %275 : vector<1x128xf32> to vector<8x128xf32>
    %277 = arith.addf %274, %276 : vector<8x128xf32>
    %cst_101 = arith.constant 0.000000e+00 : f32
    %278 = vector.broadcast %cst_101 : f32 to vector<8x128xf32>
    %279 = arith.maximumf %277, %278 : vector<8x128xf32>
    %280 = arith.truncf %279 : vector<8x128xf32> to vector<8x128xbf16>
    %c0_102 = arith.constant 0 : index
    %c0_103 = arith.constant 0 : index
    %281 = vector.load %arg7[%c0_102, %c0_103] : memref<128x128xbf16, #tpu.memory_space<vmem>>, vector<128x128xbf16>
    %cst_104 = arith.constant dense<0.000000e+00> : vector<8x128xf32>
    %282 = tpu.matmul %280, %281, %cst_104 {dimension_numbers = #tpu.dot_dimension_numbers<[1], [0], [0], [1], [0, 0, 1, 1], [], []>} : vector<8x128xbf16>, vector<128x128xbf16>, vector<8x128xf32> -> vector<8x128xf32>
    %c0_105 = arith.constant 0 : index
    %c0_106 = arith.constant 0 : index
    %283 = vector.load %arg8[%c0_105, %c0_106] : memref<1x128xf32, #tpu.memory_space<vmem>>, vector<1x128xf32>
    %284 = vector.broadcast %283 : vector<1x128xf32> to vector<8x128xf32>
    %285 = arith.addf %282, %284 : vector<8x128xf32>
    %cst_107 = arith.constant 0.000000e+00 : f32
    %286 = vector.broadcast %cst_107 : f32 to vector<8x128xf32>
    %287 = arith.maximumf %285, %286 : vector<8x128xf32>
    %288 = arith.truncf %287 : vector<8x128xf32> to vector<8x128xbf16>
    %c0_108 = arith.constant 0 : index
    %c0_109 = arith.constant 0 : index
    %289 = vector.load %arg9[%c0_108, %c0_109] : memref<128x128xbf16, #tpu.memory_space<vmem>>, vector<128x128xbf16>
    %cst_110 = arith.constant dense<0.000000e+00> : vector<8x128xf32>
    %290 = tpu.matmul %288, %289, %cst_110 {dimension_numbers = #tpu.dot_dimension_numbers<[1], [0], [0], [1], [0, 0, 1, 1], [], []>} : vector<8x128xbf16>, vector<128x128xbf16>, vector<8x128xf32> -> vector<8x128xf32>
    %c0_111 = arith.constant 0 : index
    %c0_112 = arith.constant 0 : index
    %291 = vector.load %arg10[%c0_111, %c0_112] : memref<1x128xf32, #tpu.memory_space<vmem>>, vector<1x128xf32>
    %292 = vector.broadcast %291 : vector<1x128xf32> to vector<8x128xf32>
    %293 = arith.addf %290, %292 : vector<8x128xf32>
    %c0_113 = arith.constant 0 : index
    %c0_114 = arith.constant 0 : index
    %294 = vector.load %arg11[%c0_113, %c0_114] : memref<8x128xf32, #tpu.memory_space<vmem>>, vector<8x128xf32>
    tpu.vector_store %arg11[%c0_113, %c0_114], %293 {strides = array<i32>} : memref<8x128xf32, #tpu.memory_space<vmem>>, vector<8x128xf32>,
    return
  }
  func.func @transform_0(%arg0: i32) -> (i32, i32) {
    %c0_i32 = arith.constant 0 : i32
    %c0_i32_0 = arith.constant 0 : i32
    %c0_i32_1 = arith.constant 0 : i32
    return %c0_i32, %c0_i32_0 : i32, i32
  }
  func.func @transform_1(%arg0: i32) -> (i32, i32) {
    %c0_i32 = arith.constant 0 : i32
    %c0_i32_0 = arith.constant 0 : i32
    %c0_i32_1 = arith.constant 0 : i32
    return %c0_i32, %c0_i32_0 : i32, i32
  }
  func.func @transform_2(%arg0: i32) -> (i32, i32) {
    %c0_i32 = arith.constant 0 : i32
    %c0_i32_0 = arith.constant 0 : i32
    %c0_i32_1 = arith.constant 0 : i32
    return %c0_i32, %c0_i32_0 : i32, i32
  }
  func.func @transform_3(%arg0: i32) -> (i32, i32) {
    %c0_i32 = arith.constant 0 : i32
    %c0_i32_0 = arith.constant 0 : i32
    %c0_i32_1 = arith.constant 0 : i32
    return %c0_i32, %c0_i32_0 : i32, i32
  }
  func.func @transform_4(%arg0: i32) -> (i32, i32) {
    %c0_i32 = arith.constant 0 : i32
    %c0_i32_0 = arith.constant 0 : i32
    %c0_i32_1 = arith.constant 0 : i32
    return %c0_i32, %c0_i32_0 : i32, i32
  }
  func.func @transform_5(%arg0: i32) -> (i32, i32) {
    %c0_i32 = arith.constant 0 : i32
    %c0_i32_0 = arith.constant 0 : i32
    %c0_i32_1 = arith.constant 0 : i32
    return %c0_i32, %c0_i32_0 : i32, i32
  }
  func.func @transform_6(%arg0: i32) -> (i32, i32) {
    %c0_i32 = arith.constant 0 : i32
    %c0_i32_0 = arith.constant 0 : i32
    %c0_i32_1 = arith.constant 0 : i32
    return %c0_i32, %c0_i32_0 : i32, i32
  }
  func.func @transform_7(%arg0: i32) -> (i32, i32) {
    %c0_i32 = arith.constant 0 : i32
    %c0_i32_0 = arith.constant 0 : i32
    %c0_i32_1 = arith.constant 0 : i32
    return %c0_i32, %c0_i32_0 : i32, i32
  }
  func.func @transform_8(%arg0: i32) -> (i32, i32) {
    %c0_i32 = arith.constant 0 : i32
    %c0_i32_0 = arith.constant 0 : i32
    %c0_i32_1 = arith.constant 0 : i32
    return %c0_i32, %c0_i32_0 : i32, i32
  }
  func.func @transform_9(%arg0: i32) -> (i32, i32) {
    %c0_i32 = arith.constant 0 : i32
    %c0_i32_0 = arith.constant 0 : i32
    %c0_i32_1 = arith.constant 0 : i32
    return %c0_i32, %c0_i32_0 : i32, i32
  }
  func.func @transform_10(%arg0: i32) -> (i32, i32) {
    %c0_i32 = arith.constant 0 : i32
    %c0_i32_0 = arith.constant 0 : i32
    %c0_i32_1 = arith.constant 0 : i32
    return %c0_i32, %c0_i32_0 : i32, i32
  }
}

</mosaic_0001>

<bundles_post_ra>
// kernel: tpu_custom_call.1
= control target key start
LH: loop header
LB: loop body
LE: loop exit
PB: predicated region body
PF: predicated region fallthrough
CT: control target
= control target key end

     0   :  { %15 = vsyncpa [#allocation4], 0  ;;  %s2680_s0 = inlined_call_operand.vmem [shape: bf16[64,32], index: 0, kind: input, shape index: {}]   ;;  %s2681_s1 = inlined_call_operand.hbm [shape: bf16[32,512], index: 1, kind: input, shape index: {}]   ;;  %s2682_s2 = inlined_call_operand.hbm [shape: bf16[128,512], index: 2, kind: input, shape index: {}]   ;;  %s2683_s3 = inlined_call_operand.vmem [shape: f32[1,512], index: 3, kind: input, shape index: {}]   ;;  %s2684_s4 = inlined_call_operand.hbm [shape: bf16[128,128], index: 4, kind: input, shape index: {}]   ;;  %s2685_s5 = inlined_call_operand.vmem [shape: f32[1,128], index: 5, kind: input, shape index: {}]   ;;  %s2686_s6 = inlined_call_operand.hbm [shape: bf16[128,128], index: 6, kind: input, shape index: {}]   ;;  %s2687_s7 = inlined_call_operand.vmem [shape: f32[1,128], index: 7, kind: input, shape index: {}]   ;;  %s2688_s8 = inlined_call_operand.hbm [shape: bf16[128,128], index: 8, kind: input, shape index: {}]   ;;  %s2689_s9 = inlined_call_operand.vmem [shape: f32[1,128], index: 9, kind: input, shape index: {}]   ;;  %s2690_s10 = inlined_call_operand.hbm [shape: f32[8,128], index: 10, kind: output, shape index: {}]  }
   0x1   :  { %16 = vsyncpa [#allocation7], 0 }
   0x2   :  { %17 = vsyncpa [#allocation10], 0 }
   0x3   :  { %18 = vsyncpa [#allocation5], 0  ;;  %s38_s15 = sshll.u32 %s2682_s2, 4  ;;  %s2086_s16 = smov [#allocation6]   ;;  %s39_s15 = int_to_ptr.hbm [resolvable:$true] %s38_s15 }
   0x4   :  { %s40_s17 = sshll.u32 %s2086_s16, 4  ;;  %s2087_s18 = smov 256   ;;  %s41_s17 = int_to_ptr.vmem [resolvable:$true] %s40_s17 }
   0x5   :  { %s2088_s19 = smov 16   ;;  %s68_s22 = sshll.u32 %s2686_s6, 4  ;;  %s69_s22 = int_to_ptr.hbm [resolvable:$true] %s68_s22 }
   0x6   :  { %46 = dma.hbm_to_vmem [thread:$0]  %s39_s15, 4096, %s41_s17, [#allocation7], %s2087_s18, %s2087_s18, %s2088_s19  }
   0x7   :  { %s2089_s23 = smov [#allocation9]   ;;  %s25_s27 = sshll.u32 %s2681_s1, 4  ;;  %s26_s27 = int_to_ptr.hbm [resolvable:$true] %s25_s27 }
   0x8   :  { %s70_s24 = sshll.u32 %s2089_s23, 4  ;;  %s2090_s2 = smov 64   ;;  %s71_s24 = int_to_ptr.vmem [resolvable:$true] %s70_s24 }
   0x9   :  { %s2091_s28 = smov 4   ;;  %s53_s11 = sshll.u32 %s2684_s4, 4  ;;  %s54_s11 = int_to_ptr.hbm [resolvable:$true] %s53_s11 }
   0xa   :  { %76 = dma.hbm_to_vmem [thread:$0]  %s69_s22, 1024, %s71_s24, [#allocation10], %s2090_s2, %s2090_s2, %s2091_s28  }
   0xb   :  { %s2092_s12 = smov [#allocation3]   ;;  %s2093_s6 = smov [#allocation8]  }
   0xc   :  { %s27_s13 = sshll.u32 %s2092_s12, 4  ;;  %s55_s14 = sshll.u32 %s2093_s6, 4  ;;  %s28_s13 = int_to_ptr.vmem [resolvable:$true] %s27_s13  ;;  %s56_s14 = int_to_ptr.vmem [resolvable:$true] %s55_s14 }
   0xd   :  { %33 = dma.hbm_to_vmem [thread:$0]  %s26_s27, 1024, %s28_s13, [#allocation4], %s2087_s18, %s2087_s18, %s2088_s19  }
   0xe   :  { %s83_s1 = sshll.u32 %s2688_s8, 4  ;;  %s2094_s17 = smov [#allocation11]   ;;  %s84_s1 = int_to_ptr.hbm [resolvable:$true] %s83_s1 }
   0xf   :  { %61 = dma.hbm_to_vmem [thread:$0]  %s54_s11, 1024, %s56_s14, [#allocation7], %s2090_s2, %s2090_s2, %s2091_s28  }
  0x10   :  { %s85_s20 = sshll.u32 %s2094_s17, 4  ;;  %s86_s20 = int_to_ptr.vmem [resolvable:$true] %s85_s20 }
  0x11   :  { %91 = dma.hbm_to_vmem [thread:$0]  %s84_s1, 1024, %s86_s20, [#allocation10], %s2090_s2, %s2090_s2, %s2091_s28  }
  0x12   :  { %2078 = dma.done.wait [#allocation4], 1024  }
  0x13   :  { %2079 = vsyncadd [#allocation4], 4294966272 }
  0x14   :  { %2080 = dma.done.wait [#allocation7], 5120  }
  0x15   :  { %2081 = vsyncadd [#allocation7], 4294962176 }
  0x16   :  { %2082 = dma.done.wait [#allocation10], 2048  }
  0x17   :  { %2083 = vsyncadd [#allocation10], 4294965248  ;;  %v1518_v0 = vld [vmem:[#allocation3 + $0x20] sm:$0xf]  ;;  %v1782_v1 = vld [vmem:[#allocation3 + $0x2c] sm:$0xf0] }
  0x18   :  { %v1780_v2 = vld [vmem:[#allocation3 + $0x24] sm:$0xf]  ;;  %v1519_v3 = vor.u32 %v1782_v1, %v1518_v0  ;;  %v1520_v4 = vld [vmem:[#allocation3 + $0x30] sm:$0xf0]  ;;  %v1526_v5 = vld [vmem:[#allocation3 + $0x28] sm:$0xf] }
  0x19   :  { %v1783_v6 = vld [vmem:[#allocation3 + $0x34] sm:$0xf0]  ;;  %v1523_v7 = vor.u32 %v1780_v2, %v1520_v4  ;;  %v1781_v9 = vld [vmem:[#allocation3 + $0x2c] sm:$0xf]  ;;  %v1528_v10 = vld [vmem:[#allocation3 + $0x38] sm:$0xf0] }
  0x1a   :  { %v1527_v8 = vor.u32 %v1783_v6, %v1526_v5  ;;  %v1502_v11 = vld [vmem:[#allocation3] sm:$0xf]  ;;  %220 = vmatpush.bf16.msra.mxu0 %v1519_v3  ;;  %v1531_v12 = vor.u32 %v1781_v9, %v1528_v10  ;;  %v1778_v13 = vld [vmem:[#allocation3 + $0xc] sm:$0xf0]  ;;  %v1776_v14 = vld [vmem:[#allocation3 + $0x4] sm:$0xf] }
  0x1b   :  { %v1504_v15 = vld [vmem:[#allocation3 + $0x10] sm:$0xf0]  ;;  %249 = vmatpush.bf16.msra.mxu1 %v1523_v7  ;;  %v1503_v16 = vor.u32 %v1778_v13, %v1502_v11  ;;  %v1510_v18 = vld [vmem:[#allocation3 + $0x8] sm:$0xf]  ;;  %v1779_v19 = vld [vmem:[#allocation3 + $0x14] sm:$0xf0] }
  0x1c   :  { %278 = vmatpush.bf16.msra.mxu2 %v1527_v8  ;;  %v1507_v17 = vor.u32 %v1776_v14, %v1504_v15  ;;  %v1777_v20 = vld [vmem:[#allocation3 + $0xc] sm:$0xf]  ;;  %307 = vmatpush.bf16.msra.mxu3 %v1531_v12  ;;  %v1511_v21 = vor.u32 %v1779_v19, %v1510_v18  ;;  %v1512_v22 = vld [vmem:[#allocation3 + $0x18] sm:$0xf0]  ;;  %v1772_v23 = vld [vmem:[%s2680_s0] sm:$0xff]  ;;  %vm201_vm0 = vcmask 261120  }
  0x1d   :  { %v1662_v24 = vld [vmem:[#allocation6 + $0xe0] sm:$0xf]  ;;  %v1515_v25 = vor.u32 %v1777_v20, %v1512_v22  ;;  %v1814_v26 = vld [vmem:[#allocation6 + $0xec] sm:$0xf0]  ;;  %v1812_v27 = vld [vmem:[#allocation6 + $0xe4] sm:$0xf] }
  0x1e   :  { %v1664_v28 = vld [vmem:[#allocation6 + $0xf0] sm:$0xf0]  ;;  %221 = vmatpush.bf16.msra.mxu0 %v1503_v16  ;;  %v2170_v29 = vor.u32 %v1814_v26, %v1662_v24  ;;  %v1670_v31 = vld [vmem:[#allocation6 + $0xe8] sm:$0xf]  ;;  %v1815_v32 = vld [vmem:[#allocation6 + $0xf4] sm:$0xf0] }
  0x1f   :  { %v2172_v30 = vor.u32 %v1812_v27, %v1664_v28  ;;  %v1813_v33 = vld [vmem:[#allocation6 + $0xec] sm:$0xf]  ;;  %250 = vmatpush.bf16.msra.mxu1 %v1507_v17  ;;  %v2174_v34 = vor.u32 %v1815_v32, %v1670_v31  ;;  %v1672_v35 = vld [vmem:[#allocation6 + $0xf8] sm:$0xf0]  ;;  %v1646_v36 = vld [vmem:[#allocation6 + $0xc0] sm:$0xf] }
  0x20   :  { %279 = vmatpush.bf16.msra.mxu2 %v1511_v21  ;;  %v1810_v37 = vld [vmem:[#allocation6 + $0xcc] sm:$0xf0]  ;;  %308 = vmatpush.bf16.msra.mxu3 %v1515_v25  ;;  %v2177_v38 = vor.u32 %v1813_v33, %v1672_v35  ;;  %v1808_v40 = vld [vmem:[#allocation6 + $0xc4] sm:$0xf]  ;;  %v1648_v41 = vld [vmem:[#allocation6 + $0xd0] sm:$0xf0] }
  0x21   :  { %v2179_v39 = vor.u32 %v1810_v37, %v1646_v36  ;;  %v1654_v42 = vld [vmem:[#allocation6 + $0xc8] sm:$0xf]  ;;  %1532 = vmatmul.msk.bf16.vlgmr.msra.gmra.mxu0 %vm201_vm0, %v1772_v23  ;;  %v2183_v43 = vor.u32 %v1808_v40, %v1648_v41  ;;  %v1811_v44 = vld [vmem:[#allocation6 + $0xd4] sm:$0xf0]  ;;  %v1809_v45 = vld [vmem:[#allocation6 + $0xcc] sm:$0xf] }
  0x22   :  { %561 = vmatpush.bf16.msrb.mxu0 %v2170_v29  ;;  %v1656_v46 = vld [vmem:[#allocation6 + $0xd8] sm:$0xf0]  ;;  %1536 = vmatmul.msk.bf16.vlgmr.msra.gmra.mxu1 %vm201_vm0, %v1772_v23  ;;  %v1630_v47 = vld [vmem:[#allocation6 + $0xa0] sm:$0xf]  ;;  %v1806_v48 = vld [vmem:[#allocation6 + $0xac] sm:$0xf0]  ;;  %v2189_v49 = vor.u32 %v1811_v44, %v1654_v42 }
  0x23   :  { %574 = vmatpush.bf16.msrb.mxu1 %v2172_v30  ;;  %1540 = vmatmul.msk.bf16.vlgmr.msra.gmra.mxu2 %vm201_vm0, %v1772_v23  ;;  %v1804_v50 = vld [vmem:[#allocation6 + $0xa4] sm:$0xf]  ;;  %v1632_v51 = vld [vmem:[#allocation6 + $0xb0] sm:$0xf0]  ;;  %v2193_v52 = vor.u32 %v1809_v45, %v1656_v46  ;;  %v2195_v53 = vor.u32 %v1806_v48, %v1630_v47  ;;  %v1638_v54 = vld [vmem:[#allocation6 + $0xa8] sm:$0xf] }
  0x24   :  { %1544 = vmatmul.msk.bf16.vlgmr.msra.gmra.mxu3 %vm201_vm0, %v1772_v23  ;;  %587 = vmatpush.bf16.msrb.mxu2 %v2174_v34  ;;  %v1807_v55 = vld [vmem:[#allocation6 + $0xb4] sm:$0xf0]  ;;  %v1805_v56 = vld [vmem:[#allocation6 + $0xac] sm:$0xf]  ;;  %v2198_v57 = vor.u32 %v1804_v50, %v1632_v51  ;;  %v1640_v58 = vld [vmem:[#allocation6 + $0xb8] sm:$0xf0] }
  0x25   :  { %600 = vmatpush.bf16.msrb.mxu3 %v2177_v38  ;;  %v1614_v59 = vld [vmem:[#allocation6 + $0x80] sm:$0xf]  ;;  %v1802_v60 = vld [vmem:[#allocation6 + $0x8c] sm:$0xf0]  ;;  %v1800_v61 = vld [vmem:[#allocation6 + $0x84] sm:$0xf]  ;;  %v2201_v63 = vor.u32 %v1807_v55, %v1638_v54  ;;  %v2205_v0 = vor.u32 %v1805_v56, %v1640_v58 }
  0x26   :  { %562 = vmatpush.bf16.msrb.mxu0 %v2179_v39  ;;  %v1616_v62 = vld [vmem:[#allocation6 + $0x90] sm:$0xf0]  ;;  %v2207_v1 = vor.u32 %v1802_v60, %v1614_v59  ;;  %v1622_v2 = vld [vmem:[#allocation6 + $0x88] sm:$0xf]  ;;  %v1803_v3 = vld [vmem:[#allocation6 + $0x94] sm:$0xf0] }
  0x27   :  { %575 = vmatpush.bf16.msrb.mxu1 %v2183_v43  ;;  %v1801_v4 = vld [vmem:[#allocation6 + $0x8c] sm:$0xf]  ;;  %v2210_v5 = vor.u32 %v1800_v61, %v1616_v62  ;;  %v1624_v6 = vld [vmem:[#allocation6 + $0x98] sm:$0xf0]  ;;  %v1598_v7 = vld [vmem:[#allocation6 + $0x60] sm:$0xf]  ;;  %v2216_v12 = vor.u32 %v1803_v3, %v1622_v2 }
  0x28   :  { %588 = vmatpush.bf16.msrb.mxu2 %v2189_v49  ;;  %v1798_v8 = vld [vmem:[#allocation6 + $0x6c] sm:$0xf0]  ;;  %v1796_v9 = vld [vmem:[#allocation6 + $0x64] sm:$0xf]  ;;  %v1600_v10 = vld [vmem:[#allocation6 + $0x70] sm:$0xf0]  ;;  %v2220_v15 = vor.u32 %v1801_v4, %v1624_v6 }
  0x29   :  { %601 = vmatpush.bf16.msrb.mxu3 %v2193_v52  ;;  %v1773_v11 = vld [vmem:[%s2680_s0 + $0x8] sm:$0xff]  ;;  %v1799_v14 = vld [vmem:[#allocation6 + $0x74] sm:$0xf0]  ;;  %v2222_v16 = vor.u32 %v1798_v8, %v1598_v7  ;;  %v1608_v18 = vld [vmem:[#allocation6 + $0x78] sm:$0xf0]  ;;  %v2225_v20 = vor.u32 %v1796_v9, %v1600_v10  ;;  %v2095_v10 = vmov 0  }
  0x2a   :  { %563 = vmatpush.bf16.msrb.mxu0 %v2195_v53  ;;  %v1606_v13 = vld [vmem:[#allocation6 + $0x68] sm:$0xf]  ;;  %v1797_v17 = vld [vmem:[#allocation6 + $0x6c] sm:$0xf]  ;;  %v1582_v19 = vld [vmem:[#allocation6 + $0x40] sm:$0xf] }
  0x2b   :  { %576 = vmatpush.bf16.msrb.mxu1 %v2198_v57  ;;  %v1794_v21 = vld [vmem:[#allocation6 + $0x4c] sm:$0xf0]  ;;  %v1792_v22 = vld [vmem:[#allocation6 + $0x44] sm:$0xf]  ;;  %v1584_v23 = vld [vmem:[#allocation6 + $0x50] sm:$0xf0]  ;;  %v2228_v24 = vor.u32 %v1799_v14, %v1606_v13  ;;  %v2232_v25 = vor.u32 %v1797_v17, %v1608_v18 }
  0x2c   :  { %589 = vmatpush.bf16.msrb.mxu2 %v2201_v63  ;;  %v2234_v26 = vor.u32 %v1794_v21, %v1582_v19  ;;  %v1590_v27 = vld [vmem:[#allocation6 + $0x48] sm:$0xf]  ;;  %v1795_v28 = vld [vmem:[#allocation6 + $0x54] sm:$0xf0]  ;;  %v2238_v31 = vor.u32 %v1792_v22, %v1584_v23  ;;  %v1793_v32 = vld [vmem:[#allocation6 + $0x4c] sm:$0xf] }
  0x2d   :  { %602 = vmatpush.bf16.msrb.mxu3 %v2205_v0  ;;  %v1592_v33 = vld [vmem:[#allocation6 + $0x58] sm:$0xf0]  ;;  %v2244_v35 = vor.u32 %v1795_v28, %v1590_v27  ;;  %v1566_v36 = vld [vmem:[#allocation6 + $0x20] sm:$0xf]  ;;  %v1790_v37 = vld [vmem:[#allocation6 + $0x2c] sm:$0xf0] }
  0x2e   :  { %564 = vmatpush.bf16.msrb.mxu0 %v2207_v1  ;;  %v1788_v40 = vld [vmem:[#allocation6 + $0x24] sm:$0xf]  ;;  %v2248_v41 = vor.u32 %v1793_v32, %v1592_v33  ;;  %v2250_v42 = vor.u32 %v1790_v37, %v1566_v36  ;;  %v1568_v44 = vld [vmem:[#allocation6 + $0x30] sm:$0xf0]  ;;  %v1574_v45 = vld [vmem:[#allocation6 + $0x28] sm:$0xf] }
  0x2f   :  { %577 = vmatpush.bf16.msrb.mxu1 %v2210_v5  ;;  %v1791_v46 = vld [vmem:[#allocation6 + $0x34] sm:$0xf0]  ;;  %v2253_v47 = vor.u32 %v1788_v40, %v1568_v44  ;;  %v1789_v48 = vld [vmem:[#allocation6 + $0x2c] sm:$0xf]  ;;  %v1576_v50 = vld [vmem:[#allocation6 + $0x38] sm:$0xf0] }
  0x30   :  { %590 = vmatpush.bf16.msrb.mxu2 %v2216_v12  ;;  %v1550_v51 = vld [vmem:[#allocation6] sm:$0xf]  ;;  %v1786_v54 = vld [vmem:[#allocation6 + $0xc] sm:$0xf0]  ;;  %v1784_v55 = vld [vmem:[#allocation6 + $0x4] sm:$0xf]  ;;  %v2256_v58 = vor.u32 %v1791_v46, %v1574_v45  ;;  %v2260_v59 = vor.u32 %v1789_v48, %v1576_v50 }
  0x31   :  { %603 = vmatpush.bf16.msrb.mxu3 %v2220_v15  ;;  %1533 = vmatmul.msk.bf16.gmra.mxu0 %vm201_vm0, %v1773_v11  ;;  %v1552_v56 = vld [vmem:[#allocation6 + $0x10] sm:$0xf0]  ;;  %v2262_v60 = vor.u32 %v1786_v54, %v1550_v51  ;;  %v1558_v61 = vld [vmem:[#allocation6 + $0x8] sm:$0xf]  ;;  %v1787_v62 = vld [vmem:[#allocation6 + $0x14] sm:$0xf0] }
  0x32   :  { %565 = vmatpush.bf16.msrb.mxu0 %v2222_v16  ;;  %1537 = vmatmul.msk.bf16.gmra.mxu1 %vm201_vm0, %v1773_v11  ;;  %v2265_v2 = vor.u32 %v1784_v55, %v1552_v56  ;;  %v1785_v3 = vld [vmem:[#allocation6 + $0xc] sm:$0xf]  ;;  %v1560_v4 = vld [vmem:[#allocation6 + $0x18] sm:$0xf0]  ;;  %v2268_v6 = vor.u32 %v1787_v62, %v1558_v61  ;;  %v1774_v8 = vld [vmem:[%s2680_s0 + $0x10] sm:$0xff]  ;;  %s2096_s29 = smov [#allocation12]  }
  0x33   :  { %578 = vmatpush.bf16.msrb.mxu1 %v2225_v20  ;;  %1541 = vmatmul.msk.bf16.gmra.mxu2 %vm201_vm0, %v1773_v11  ;;  %v2272_v7 = vor.u32 %v1785_v3, %v1560_v4  ;;  %v1775_v9 = vld [vmem:[%s2680_s0 + $0x18] sm:$0xff]  ;;  %v131_v21 = vld [vmem:[%s2683_s3] sm:$0xf]  ;;  %s1463_s30 = sshll.u32 %s2096_s29, 4  ;;  %s1465_s13 = sshll.u32 %s2690_s10, 4  ;;  %s1464_s30 = int_to_ptr.vmem [resolvable:$true] %s1463_s30  ;;  %s1466_s13 = int_to_ptr.hbm [resolvable:$true] %s1465_s13 }
  0x34   :  { %1545 = vmatmul.msk.bf16.gmra.mxu3 %vm201_vm0, %v1773_v11  ;;  %591 = vmatpush.bf16.msrb.mxu2 %v2228_v24  ;;  %v2366_v22 = vperm.slane %v131_v21, 0  ;;  %v2368_v23 = vperm.slane %v131_v21, 3  ;;  %v2372_v28 = vperm.slane %v131_v21, 1  ;;  %v2383_v45 = vperm.slane %v131_v21, 2 }
  0x35   :  { %604 = vmatpush.bf16.msrb.mxu3 %v2232_v25 }
  0x36   :  { %566 = vmatpush.bf16.msrb.mxu0 %v2234_v26 }
  0x37   :  { %579 = vmatpush.bf16.msrb.mxu1 %v2238_v31 }
  0x38   :  { %592 = vmatpush.bf16.msrb.mxu2 %v2244_v35 }
  0x39   :  { %605 = vmatpush.bf16.msrb.mxu3 %v2248_v41 }
  0x3a   :  { %567 = vmatpush.bf16.msrb.mxu0 %v2250_v42 }
  0x3b   :  { %580 = vmatpush.bf16.msrb.mxu1 %v2253_v47 }
  0x3c   :  { %593 = vmatpush.bf16.msrb.mxu2 %v2256_v58 }
  0x3d   :  { %606 = vmatpush.bf16.msrb.mxu3 %v2260_v59 }
  0x3e   :  { %568 = vmatpush.bf16.msrb.mxu0 %v2262_v60 }
  0x3f   :  { %581 = vmatpush.bf16.msrb.mxu1 %v2265_v2 }
  0x40   :  { %594 = vmatpush.bf16.msrb.mxu2 %v2268_v6 }
  0x41   :  { %607 = vmatpush.bf16.msrb.mxu3 %v2272_v7  ;;  %1534 = vmatmul.msk.bf16.gmra.mxu0 %vm201_vm0, %v1774_v8 }
  0x42   :  { %643 = vmatpush.bf16.msra.mxu0 %v2170_v29  ;;  %1538 = vmatmul.msk.bf16.gmra.mxu1 %vm201_vm0, %v1774_v8 }
  0x43   :  { %656 = vmatpush.bf16.msra.mxu1 %v2172_v30  ;;  %1542 = vmatmul.msk.bf16.gmra.mxu2 %vm201_vm0, %v1774_v8 }
  0x44   :  { %669 = vmatpush.bf16.msra.mxu2 %v2174_v34  ;;  %1546 = vmatmul.msk.bf16.gmra.mxu3 %vm201_vm0, %v1774_v8 }
  0x45   :  { %682 = vmatpush.bf16.msra.mxu3 %v2177_v38 }
  0x46   :  { %644 = vmatpush.bf16.msra.mxu0 %v2179_v39 }
  0x47   :  { %657 = vmatpush.bf16.msra.mxu1 %v2183_v43 }
  0x48   :  { %670 = vmatpush.bf16.msra.mxu2 %v2189_v49 }
  0x49   :  { %683 = vmatpush.bf16.msra.mxu3 %v2193_v52 }
  0x4a   :  { %645 = vmatpush.bf16.msra.mxu0 %v2195_v53 }
  0x4b   :  { %658 = vmatpush.bf16.msra.mxu1 %v2198_v57 }
  0x4c   :  { %671 = vmatpush.bf16.msra.mxu2 %v2201_v63 }
  0x4d   :  { %684 = vmatpush.bf16.msra.mxu3 %v2205_v0 }
  0x4e   :  { %646 = vmatpush.bf16.msra.mxu0 %v2207_v1 }
  0x4f   :  { %659 = vmatpush.bf16.msra.mxu1 %v2210_v5 }
  0x50   :  { %672 = vmatpush.bf16.msra.mxu2 %v2216_v12 }
  0x51   :  { %685 = vmatpush.bf16.msra.mxu3 %v2220_v15  ;;  %1535 = vmatmul.msk.bf16.gmra.mxu0 %vm201_vm0, %v1775_v9 }
  0x52   :  { %647 = vmatpush.bf16.msra.mxu0 %v2222_v16  ;;  %1539 = vmatmul.msk.bf16.gmra.mxu1 %vm201_vm0, %v1775_v9 }
  0x53   :  { %660 = vmatpush.bf16.msra.mxu1 %v2225_v20  ;;  %1543 = vmatmul.msk.bf16.gmra.mxu2 %vm201_vm0, %v1775_v9 }
  0x54   :  { %673 = vmatpush.bf16.msra.mxu2 %v2228_v24  ;;  %1547 = vmatmul.msk.bf16.gmra.mxu3 %vm201_vm0, %v1775_v9 }
  0x55   :  { %686 = vmatpush.bf16.msra.mxu3 %v2232_v25 }
  0x56   :  { %648 = vmatpush.bf16.msra.mxu0 %v2234_v26 }
  0x57   :  { %661 = vmatpush.bf16.msra.mxu1 %v2238_v31 }
  0x58   :  { %674 = vmatpush.bf16.msra.mxu2 %v2244_v35 }
  0x59   :  { %687 = vmatpush.bf16.msra.mxu3 %v2248_v41 }
  0x5a   :  { %649 = vmatpush.bf16.msra.mxu0 %v2250_v42 }
  0x5b   :  { %662 = vmatpush.bf16.msra.mxu1 %v2253_v47 }
  0x5c   :  { %675 = vmatpush.bf16.msra.mxu2 %v2256_v58 }
  0x5d   :  { %688 = vmatpush.bf16.msra.mxu3 %v2260_v59 }
  0x5e   :  { %650 = vmatpush.bf16.msra.mxu0 %v2262_v60 }
  0x5f   :  { %663 = vmatpush.bf16.msra.mxu1 %v2265_v2 }
  0x60   :  { %676 = vmatpush.bf16.msra.mxu2 %v2268_v6 }
  0x61   :  { %689 = vmatpush.bf16.msra.mxu3 %v2272_v7  ;;  %569 = vmatmul.bf16.vlgmr.msrb.gmra.mxu0 %v2095_v10 }
  0x62   :  { %582 = vmatmul.bf16.vlgmr.msrb.gmra.mxu1 %v2095_v10  ;;  %725 = vmatpush.bf16.msrb.mxu0 %v2170_v29 }
  0x63   :  { %595 = vmatmul.bf16.vlgmr.msrb.gmra.mxu2 %v2095_v10  ;;  %738 = vmatpush.bf16.msrb.mxu1 %v2172_v30 }
  0x64   :  { %608 = vmatmul.bf16.vlgmr.msrb.gmra.mxu3 %v2095_v10  ;;  %751 = vmatpush.bf16.msrb.mxu2 %v2174_v34 }
  0x65   :  { %764 = vmatpush.bf16.msrb.mxu3 %v2177_v38 }
  0x66   :  { %726 = vmatpush.bf16.msrb.mxu0 %v2179_v39 }
  0x67   :  { %739 = vmatpush.bf16.msrb.mxu1 %v2183_v43 }
  0x68   :  { %752 = vmatpush.bf16.msrb.mxu2 %v2189_v49 }
  0x69   :  { %765 = vmatpush.bf16.msrb.mxu3 %v2193_v52 }
  0x6a   :  { %727 = vmatpush.bf16.msrb.mxu0 %v2195_v53 }
  0x6b   :  { %740 = vmatpush.bf16.msrb.mxu1 %v2198_v57 }
  0x6c   :  { %753 = vmatpush.bf16.msrb.mxu2 %v2201_v63 }
  0x6d   :  { %766 = vmatpush.bf16.msrb.mxu3 %v2205_v0 }
  0x6e   :  { %728 = vmatpush.bf16.msrb.mxu0 %v2207_v1 }
  0x6f   :  { %741 = vmatpush.bf16.msrb.mxu1 %v2210_v5 }
  0x70   :  { %754 = vmatpush.bf16.msrb.mxu2 %v2216_v12 }
  0x71   :  { %767 = vmatpush.bf16.msrb.mxu3 %v2220_v15 }
  0x72   :  { %729 = vmatpush.bf16.msrb.mxu0 %v2222_v16 }
  0x73   :  { %742 = vmatpush.bf16.msrb.mxu1 %v2225_v20 }
  0x74   :  { %755 = vmatpush.bf16.msrb.mxu2 %v2228_v24 }
  0x75   :  { %768 = vmatpush.bf16.msrb.mxu3 %v2232_v25 }
  0x76   :  { %730 = vmatpush.bf16.msrb.mxu0 %v2234_v26 }
  0x77   :  { %743 = vmatpush.bf16.msrb.mxu1 %v2238_v31 }
  0x78   :  { %756 = vmatpush.bf16.msrb.mxu2 %v2244_v35 }
  0x79   :  { %769 = vmatpush.bf16.msrb.mxu3 %v2248_v41 }
  0x7a   :  { %731 = vmatpush.bf16.msrb.mxu0 %v2250_v42 }
  0x7b   :  { %744 = vmatpush.bf16.msrb.mxu1 %v2253_v47 }
  0x7c   :  { %757 = vmatpush.bf16.msrb.mxu2 %v2256_v58 }
  0x7d   :  { %770 = vmatpush.bf16.msrb.mxu3 %v2260_v59 }
  0x7e   :  { %732 = vmatpush.bf16.msrb.mxu0 %v2262_v60 }
  0x7f   :  { %745 = vmatpush.bf16.msrb.mxu1 %v2265_v2 }
  0x80   :  { %758 = vmatpush.bf16.msrb.mxu2 %v2268_v6 }
  0x81   :  { %771 = vmatpush.bf16.msrb.mxu3 %v2272_v7 }
  0x9e   :  { %v223_v11 = vpop.f32.mrf.mxu0 }
  0x9f   :  { %v252_v13 = vpop.f32.mrf.mxu1 }
  0xa6   :  { %v2355_v14 = vpop.f32.mrf.mxu2  ;;  %v2359_v18 = vpop.f32.mrf.mxu0 }
  0xa7   :  { %v2357_v17 = vpop.f32.mrf.mxu3  ;;  %v2361_v19 = vpop.f32.mrf.mxu1 }
  0xae   :  { %v2370_v27 = vpop.f32.mrf.mxu2  ;;  %v228_v33 = vpop.f32.mrf.mxu0 }
  0xaf   :  { %v312_v32 = vpop.f32.mrf.mxu3  ;;  %v2378_v37 = vadd.f32 %v228_v33, %v2366_v22  ;;  %v257_v40 = vpop.f32.mrf.mxu1 }
  0xb0   :  { %v2375_v36 = vadd.f32 %v312_v32, %v2368_v23  ;;  %v2381_v44 = vadd.f32 %v257_v40, %v2372_v28 }
  0xb6   :  { %v286_v46 = vpop.f32.mrf.mxu2  ;;  %v230_v51 = vpop.f32.mrf.mxu0 }
  0xb7   :  { %v2386_v48 = vadd.f32 %v286_v46, %v2383_v45  ;;  %v315_v50 = vpop.f32.mrf.mxu3  ;;  %v2392_v55 = vadd.f32 %v230_v51, %v2366_v22  ;;  %v259_v56 = vpop.f32.mrf.mxu1 }
  0xb8   :  { %v2389_v54 = vadd.f32 %v315_v50, %v2368_v23  ;;  %v2395_v61 = vadd.f32 %v259_v56, %v2372_v28 }
  0xb9   :  { %2691 = vst [vmem:[#allocation17_spill] sm:$0xff] %v2392_v55 }
  0xba   :  { %2692 = vst [vmem:[#allocation18_spill] sm:$0xff] %v2395_v61 }
  0xbe   :  { %v288_v62 = vpop.f32.mrf.mxu2  ;;  %v233_v8 = vpop.f32.mrf.mxu0 }
  0xbf   :  { %v2398_v3 = vadd.f32 %v288_v62, %v2383_v45  ;;  %v317_v4 = vpop.f32.mrf.mxu3  ;;  %v2404_v10 = vadd.f32 %v233_v8, %v2366_v22  ;;  %v262_v21 = vpop.f32.mrf.mxu1 }
  0xc0   :  { %v2401_v9 = vadd.f32 %v317_v4, %v2368_v23  ;;  %v2407_v32 = vadd.f32 %v262_v21, %v2372_v28 }
  0xc1   :  { %2693 = vst [vmem:[#allocation19_spill] sm:$0xff] %v2398_v3 }
  0xc2   :  { %2694 = vst [vmem:[#allocation20_spill] sm:$0xff] %v2401_v9 }
  0xc3   :  { %2695 = vst [vmem:[#allocation21_spill] sm:$0xff] %v2404_v10 }
  0xc4   :  { %2696 = vst [vmem:[#allocation22_spill] sm:$0xff] %v2407_v32 }
  0xc6   :  { %v291_v33 = vpop.f32.mrf.mxu2  ;;  %v235_v50 = vpop.f32.mrf.mxu0 }
  0xc7   :  { %v2410_v40 = vadd.f32 %v291_v33, %v2383_v45  ;;  %v320_v46 = vpop.f32.mrf.mxu3  ;;  %v2416_v56 = vadd.f32 %v235_v50, %v2366_v22  ;;  %v264_v62 = vpop.f32.mrf.mxu1 }
  0xc8   :  { %v2413_v51 = vadd.f32 %v320_v46, %v2368_v23  ;;  %v2419_v4 = vadd.f32 %v264_v62, %v2372_v28 }
  0xc9   :  { %2697 = vst [vmem:[#allocation23_spill] sm:$0xff] %v2410_v40 }
  0xca   :  { %2698 = vst [vmem:[#allocation24_spill] sm:$0xff] %v2413_v51 }
  0xcb   :  { %2699 = vst [vmem:[#allocation25_spill] sm:$0xff] %v2416_v56 }
  0xcc   :  { %2700 = vst [vmem:[#allocation26_spill] sm:$0xff] %v2419_v4 }
  0xce   :  { %v293_v8 = vpop.f32.mrf.mxu2  ;;  %v238_v10 = vpop.f32.mrf.mxu0 }
  0xcf   :  { %v2422_v21 = vadd.f32 %v293_v8, %v2383_v45  ;;  %v322_v32 = vpop.f32.mrf.mxu3  ;;  %v2428_v40 = vadd.f32 %v238_v10, %v2366_v22  ;;  %v267_v46 = vpop.f32.mrf.mxu1 }
  0xd0   :  { %v2425_v33 = vadd.f32 %v322_v32, %v2368_v23  ;;  %v2431_v50 = vadd.f32 %v267_v46, %v2372_v28 }
  0xd1   :  { %2701 = vst [vmem:[#allocation27_spill] sm:$0xff] %v2422_v21 }
  0xd2   :  { %2702 = vst [vmem:[#allocation28_spill] sm:$0xff] %v2425_v33 }
  0xd3   :  { %2703 = vst [vmem:[#allocation29_spill] sm:$0xff] %v2428_v40  ;;  %v224_v40 = vadd.f32 %v223_v11, %v2366_v22  ;;  %v282_v11 = vadd.f32 %v2355_v14, %v2383_v45 }
  0xd4   :  { %2704 = vst [vmem:[#allocation30_spill] sm:$0xff] %v2431_v50  ;;  %v253_v50 = vadd.f32 %v252_v13, %v2372_v28  ;;  %v311_v13 = vadd.f32 %v2357_v17, %v2368_v23 }
  0xd6   :  { %v296_v56 = vpop.f32.mrf.mxu2  ;;  %v240_v51 = vpop.f32.mrf.mxu0 }
  0xd7   :  { %v2434_v62 = vadd.f32 %v296_v56, %v2383_v45  ;;  %v325_v4 = vpop.f32.mrf.mxu3  ;;  %v2440_v21 = vadd.f32 %v240_v51, %v2366_v22  ;;  %v269_v32 = vpop.f32.mrf.mxu1 }
  0xd8   :  { %v2437_v8 = vadd.f32 %v325_v4, %v2368_v23  ;;  %v2443_v10 = vadd.f32 %v269_v32, %v2372_v28 }
  0xd9   :  { %2705 = vst [vmem:[#allocation31_spill] sm:$0xff] %v2434_v62 }
  0xda   :  { %2706 = vst [vmem:[#allocation32_spill] sm:$0xff] %v2437_v8 }
  0xdb   :  { %2707 = vst [vmem:[#allocation33_spill] sm:$0xff] %v2440_v21 }
  0xdc   :  { %2708 = vst [vmem:[#allocation34_spill] sm:$0xff] %v2443_v10 }
  0xde   :  { %v298_v46 = vpop.f32.mrf.mxu2  ;;  %v570_v33 = vpop.f32.mrf.mxu0 }
  0xdf   :  { %v2448_v56 = vadd.f32 %v298_v46, %v2383_v45  ;;  %v327_v62 = vpop.f32.mrf.mxu3  ;;  %v613_v8 = vadd.f32 %v570_v33, %v224_v40  ;;  %v583_v51 = vpop.f32.mrf.mxu1 }
  0xe0   :  { %v2451_v4 = vadd.f32 %v327_v62, %v2368_v23  ;;  %v614_v21 = vadd.f32 %v583_v51, %v253_v50 }
  0xe1   :  { %2709 = vst [vmem:[#allocation35_spill] sm:$0xff] %v2448_v56  ;;  %v617_v9 = vmul.f32 0.5, %v613_v8 }
  0xe2   :  { %2710 = vst [vmem:[#allocation36_spill] sm:$0xff] %v2451_v4  ;;  %v618_v3 = vmul.f32 0.5, %v614_v21 }
  0xe3   :  { %1854 = vtanh.f32 %v617_v9 }
  0xe4   :  { %1856 = vtanh.f32 %v618_v3 }
  0xe6   :  { %v596_v32 = vpop.f32.mrf.mxu2  ;;  %v572_v10 = vpop.f32.mrf.mxu0 }
  0xe7   :  { %v615_v46 = vadd.f32 %v596_v32, %v282_v11  ;;  %v609_v56 = vpop.f32.mrf.mxu3  ;;  %v585_v62 = vpop.f32.mrf.mxu1 }
  0xe8   :  { %v616_v61 = vadd.f32 %v609_v56, %v311_v13 }
  0xe9   :  { %1858 = vtanh.f32 %v615_v46  ;;  %v1855_v40 = vpop.eup %1854 }
  0xea   :  { %v626_v33 = vmul.f32 0.5, %v616_v61  ;;  %v1857_v50 = vpop.eup %1856  ;;  %v621_v8 = vadd.f32 1.0, %v1855_v40 }
  0xeb   :  { %v622_v21 = vadd.f32 1.0, %v1857_v50 }
  0xec   :  { %1860 = vtanh.f32 %v626_v33  ;;  %v623_v9 = vmul.f32 0.5, %v621_v8 }
  0xed   :  { %v624_v51 = vmul.f32 0.5, %v622_v21  ;;  %v284_v21 = vadd.f32 %v2370_v27, %v2383_v45 }
  0xee   :  { %v598_v14 = vpop.f32.mrf.mxu2 }
  0xef   :  { %v1859_v3 = vpop.eup %1858  ;;  %v611_v4 = vpop.f32.mrf.mxu3  ;;  %v630_v55 = vmul.f32 0.0, %v624_v51 }
  0xf0   :  { %v631_v17 = vmul.f32 %v1859_v3, %v623_v9  ;;  %v255_v4 = vadd.f32 %v2361_v19, %v2372_v28 }
  0xf2   :  { %v1861_v23 = vpop.eup %1860  ;;  %v2457_v11 = vadd.f32 %v631_v17, %v630_v55  ;;  %v226_v55 = vadd.f32 %v2359_v18, %v2366_v22 }
  0xf3   :  { %v628_v10 = vadd.f32 1.0, %v1861_v23 }
  0xf4   :  { %1862 = vtanh.f32 %v2457_v11 }
  0xf5   :  { %v629_v56 = vmul.f32 0.5, %v628_v10 }
  0xfa   :  { %v1863_v13 = vpop.eup %1862 }
  0xfb   :  { %v634_v61 = vmul.f32 %v1863_v13, %v629_v56 }
  0xfd   :  { %v642_v32 = vpack.c.bf16 %v634_v61, %v634_v61 }
  0xff   :  { %651 = vmatmul.bf16.vlgmr.msra.gmra.mxu0 %v642_v32  ;;  %664 = vmatmul.bf16.vlgmr.msra.gmra.mxu1 %v642_v32 }
 0x100   :  { %677 = vmatmul.bf16.vlgmr.msra.gmra.mxu2 %v642_v32  ;;  %690 = vmatmul.bf16.vlgmr.msra.gmra.mxu3 %v642_v32 }
 0x101   :  { %807 = vmatpush.bf16.msra.mxu0 %v2170_v29  ;;  %820 = vmatpush.bf16.msra.mxu1 %v2172_v30 }
 0x102   :  { %833 = vmatpush.bf16.msra.mxu2 %v2174_v34  ;;  %846 = vmatpush.bf16.msra.mxu3 %v2177_v38 }
 0x105   :  { %808 = vmatpush.bf16.msra.mxu0 %v2179_v39  ;;  %821 = vmatpush.bf16.msra.mxu1 %v2183_v43 }
 0x106   :  { %834 = vmatpush.bf16.msra.mxu2 %v2189_v49  ;;  %847 = vmatpush.bf16.msra.mxu3 %v2193_v52 }
 0x109   :  { %809 = vmatpush.bf16.msra.mxu0 %v2195_v53  ;;  %822 = vmatpush.bf16.msra.mxu1 %v2198_v57 }
 0x10a   :  { %835 = vmatpush.bf16.msra.mxu2 %v2201_v63  ;;  %848 = vmatpush.bf16.msra.mxu3 %v2205_v0 }
 0x10d   :  { %810 = vmatpush.bf16.msra.mxu0 %v2207_v1  ;;  %823 = vmatpush.bf16.msra.mxu1 %v2210_v5 }
 0x10e   :  { %836 = vmatpush.bf16.msra.mxu2 %v2216_v12  ;;  %849 = vmatpush.bf16.msra.mxu3 %v2220_v15 }
 0x111   :  { %811 = vmatpush.bf16.msra.mxu0 %v2222_v16  ;;  %824 = vmatpush.bf16.msra.mxu1 %v2225_v20 }
 0x112   :  { %837 = vmatpush.bf16.msra.mxu2 %v2228_v24  ;;  %850 = vmatpush.bf16.msra.mxu3 %v2232_v25 }
 0x115   :  { %812 = vmatpush.bf16.msra.mxu0 %v2234_v26  ;;  %825 = vmatpush.bf16.msra.mxu1 %v2238_v31 }
 0x116   :  { %838 = vmatpush.bf16.msra.mxu2 %v2244_v35  ;;  %851 = vmatpush.bf16.msra.mxu3 %v2248_v41 }
 0x119   :  { %813 = vmatpush.bf16.msra.mxu0 %v2250_v42  ;;  %826 = vmatpush.bf16.msra.mxu1 %v2253_v47 }
 0x11a   :  { %839 = vmatpush.bf16.msra.mxu2 %v2256_v58  ;;  %852 = vmatpush.bf16.msra.mxu3 %v2260_v59 }
 0x11d   :  { %814 = vmatpush.bf16.msra.mxu0 %v2262_v60  ;;  %827 = vmatpush.bf16.msra.mxu1 %v2265_v2 }
 0x11e   :  { %840 = vmatpush.bf16.msra.mxu2 %v2268_v6  ;;  %853 = vmatpush.bf16.msra.mxu3 %v2272_v7 }
 0x17c   :  { %v652_v46 = vpop.f32.mrf.mxu0  ;;  %v665_v62 = vpop.f32.mrf.mxu1 }
 0x17d   :  { %v695_v40 = vadd.f32 %v652_v46, %v226_v55  ;;  %v696_v33 = vadd.f32 %v665_v62, %v255_v4 }
 0x17f   :  { %v699_v50 = vmul.f32 0.5, %v695_v40  ;;  %v700_v8 = vmul.f32 0.5, %v696_v33 }
 0x181   :  { %1864 = vtanh.f32 %v699_v50 }
 0x182   :  { %1866 = vtanh.f32 %v700_v8 }
 0x183   :  { %v678_v9 = vpop.f32.mrf.mxu2  ;;  %v691_v51 = vpop.f32.mrf.mxu3 }
 0x184   :  { %v697_v14 = vadd.f32 %v678_v9, %v284_v21  ;;  %v698_v3 = vadd.f32 %v691_v51, %v2375_v36  ;;  %v654_v18 = vpop.f32.mrf.mxu0  ;;  %v667_v22 = vpop.f32.mrf.mxu1 }
 0x186   :  { %1868 = vtanh.f32 %v697_v14  ;;  %v708_v19 = vmul.f32 0.5, %v698_v3 }
 0x187   :  { %v1865_v28 = vpop.eup %1864 }
 0x188   :  { %v1867_v17 = vpop.eup %1866  ;;  %v703_v23 = vadd.f32 1.0, %v1865_v28  ;;  %1870 = vtanh.f32 %v708_v19 }
 0x189   :  { %v704_v10 = vadd.f32 1.0, %v1867_v17 }
 0x18a   :  { %v705_v56 = vmul.f32 0.5, %v703_v23 }
 0x18b   :  { %v706_v13 = vmul.f32 0.5, %v704_v10  ;;  %v680_v61 = vpop.f32.mrf.mxu2  ;;  %v693_v32 = vpop.f32.mrf.mxu3 }
 0x18c   :  { %v1869_v27 = vpop.eup %1868 }
 0x18d   :  { %v712_v45 = vmul.f32 %v706_v13, %v2457_v11  ;;  %v713_v55 = vmul.f32 %v1869_v27, %v705_v56 }
 0x18e   :  { %v1871_v4 = vpop.eup %1870 }
 0x18f   :  { %v2500_v46 = vadd.f32 %v713_v55, %v712_v45  ;;  %v710_v36 = vadd.f32 1.0, %v1871_v4 }
 0x191   :  { %1872 = vtanh.f32 %v2500_v46  ;;  %v711_v62 = vmul.f32 0.5, %v710_v36 }
 0x197   :  { %v1873_v40 = vpop.eup %1872 }
 0x198   :  { %v716_v33 = vmul.f32 %v1873_v40, %v711_v62 }
 0x19a   :  { %v724_v50 = vpack.c.bf16 %v716_v33, %v716_v33 }
 0x19c   :  { %733 = vmatmul.bf16.vlgmr.msrb.gmra.mxu0 %v724_v50  ;;  %746 = vmatmul.bf16.vlgmr.msrb.gmra.mxu1 %v724_v50 }
 0x19d   :  { %759 = vmatmul.bf16.vlgmr.msrb.gmra.mxu2 %v724_v50  ;;  %772 = vmatmul.bf16.vlgmr.msrb.gmra.mxu3 %v724_v50 }
 0x19e   :  { %889 = vmatpush.bf16.msrb.mxu0 %v2170_v29  ;;  %902 = vmatpush.bf16.msrb.mxu1 %v2172_v30 }
 0x19f   :  { %915 = vmatpush.bf16.msrb.mxu2 %v2174_v34  ;;  %928 = vmatpush.bf16.msrb.mxu3 %v2177_v38 }
 0x1a2   :  { %890 = vmatpush.bf16.msrb.mxu0 %v2179_v39  ;;  %903 = vmatpush.bf16.msrb.mxu1 %v2183_v43 }
 0x1a3   :  { %916 = vmatpush.bf16.msrb.mxu2 %v2189_v49  ;;  %929 = vmatpush.bf16.msrb.mxu3 %v2193_v52 }
 0x1a6   :  { %891 = vmatpush.bf16.msrb.mxu0 %v2195_v53  ;;  %904 = vmatpush.bf16.msrb.mxu1 %v2198_v57 }
 0x1a7   :  { %917 = vmatpush.bf16.msrb.mxu2 %v2201_v63  ;;  %930 = vmatpush.bf16.msrb.mxu3 %v2205_v0 }
 0x1aa   :  { %892 = vmatpush.bf16.msrb.mxu0 %v2207_v1  ;;  %905 = vmatpush.bf16.msrb.mxu1 %v2210_v5 }
 0x1ab   :  { %918 = vmatpush.bf16.msrb.mxu2 %v2216_v12  ;;  %931 = vmatpush.bf16.msrb.mxu3 %v2220_v15 }
 0x1ae   :  { %893 = vmatpush.bf16.msrb.mxu0 %v2222_v16  ;;  %906 = vmatpush.bf16.msrb.mxu1 %v2225_v20 }
 0x1af   :  { %919 = vmatpush.bf16.msrb.mxu2 %v2228_v24  ;;  %932 = vmatpush.bf16.msrb.mxu3 %v2232_v25 }
 0x1b2   :  { %894 = vmatpush.bf16.msrb.mxu0 %v2234_v26  ;;  %907 = vmatpush.bf16.msrb.mxu1 %v2238_v31 }
 0x1b3   :  { %920 = vmatpush.bf16.msrb.mxu2 %v2244_v35  ;;  %933 = vmatpush.bf16.msrb.mxu3 %v2248_v41 }
 0x1b6   :  { %895 = vmatpush.bf16.msrb.mxu0 %v2250_v42  ;;  %908 = vmatpush.bf16.msrb.mxu1 %v2253_v47 }
 0x1b7   :  { %921 = vmatpush.bf16.msrb.mxu2 %v2256_v58  ;;  %934 = vmatpush.bf16.msrb.mxu3 %v2260_v59 }
 0x1ba   :  { %896 = vmatpush.bf16.msrb.mxu0 %v2262_v60  ;;  %909 = vmatpush.bf16.msrb.mxu1 %v2265_v2 }
 0x1bb   :  { %922 = vmatpush.bf16.msrb.mxu2 %v2268_v6  ;;  %935 = vmatpush.bf16.msrb.mxu3 %v2272_v7 }
 0x219   :  { %v734_v11 = vpop.f32.mrf.mxu0  ;;  %v747_v8 = vpop.f32.mrf.mxu1 }
 0x21a   :  { %v777_v21 = vadd.f32 %v734_v11, %v2378_v37  ;;  %v778_v9 = vadd.f32 %v747_v8, %v2381_v44  ;;  %v2711_v8 = vld [vmem:[#allocation17_spill] sm:$0xff] }
 0x21c   :  { %v781_v51 = vmul.f32 0.5, %v777_v21  ;;  %v782_v14 = vmul.f32 0.5, %v778_v9  ;;  %v2712_v9 = vld [vmem:[#allocation18_spill] sm:$0xff] }
 0x21e   :  { %1874 = vtanh.f32 %v781_v51 }
 0x21f   :  { %1876 = vtanh.f32 %v782_v14 }
 0x220   :  { %v760_v3 = vpop.f32.mrf.mxu2  ;;  %v773_v18 = vpop.f32.mrf.mxu3 }
 0x221   :  { %v779_v22 = vadd.f32 %v760_v3, %v2386_v48  ;;  %v780_v19 = vadd.f32 %v773_v18, %v2389_v54  ;;  %v736_v28 = vpop.f32.mrf.mxu0  ;;  %v749_v17 = vpop.f32.mrf.mxu1 }
 0x222   :  { %v2714_v17 = vld [vmem:[#allocation20_spill] sm:$0xff] }
 0x223   :  { %1878 = vtanh.f32 %v779_v22  ;;  %v790_v23 = vmul.f32 0.5, %v780_v19  ;;  %v2713_v19 = vld [vmem:[#allocation19_spill] sm:$0xff] }
 0x224   :  { %v1875_v10 = vpop.eup %1874 }
 0x225   :  { %v1877_v56 = vpop.eup %1876  ;;  %v785_v13 = vadd.f32 1.0, %v1875_v10  ;;  %1880 = vtanh.f32 %v790_v23 }
 0x226   :  { %v786_v37 = vadd.f32 1.0, %v1877_v56 }
 0x227   :  { %v787_v44 = vmul.f32 0.5, %v785_v13 }
 0x228   :  { %v788_v61 = vmul.f32 0.5, %v786_v37  ;;  %v762_v32 = vpop.f32.mrf.mxu2  ;;  %v775_v27 = vpop.f32.mrf.mxu3 }
 0x229   :  { %v1879_v45 = vpop.eup %1878 }
 0x22a   :  { %v794_v55 = vmul.f32 %v788_v61, %v2500_v46  ;;  %v795_v4 = vmul.f32 %v1879_v45, %v787_v44 }
 0x22b   :  { %v1881_v48 = vpop.eup %1880 }
 0x22c   :  { %v2540_v36 = vadd.f32 %v795_v4, %v794_v55  ;;  %v792_v54 = vadd.f32 1.0, %v1881_v48 }
 0x22e   :  { %1882 = vtanh.f32 %v2540_v36  ;;  %v793_v62 = vmul.f32 0.5, %v792_v54 }
 0x234   :  { %v1883_v40 = vpop.eup %1882 }
 0x235   :  { %v798_v33 = vmul.f32 %v1883_v40, %v793_v62 }
 0x237   :  { %v806_v50 = vpack.c.bf16 %v798_v33, %v798_v33 }
 0x239   :  { %815 = vmatmul.bf16.vlgmr.msra.gmra.mxu0 %v806_v50  ;;  %828 = vmatmul.bf16.vlgmr.msra.gmra.mxu1 %v806_v50 }
 0x23a   :  { %841 = vmatmul.bf16.vlgmr.msra.gmra.mxu2 %v806_v50  ;;  %854 = vmatmul.bf16.vlgmr.msra.gmra.mxu3 %v806_v50 }
 0x23b   :  { %971 = vmatpush.bf16.msra.mxu0 %v2170_v29  ;;  %984 = vmatpush.bf16.msra.mxu1 %v2172_v30 }
 0x23c   :  { %997 = vmatpush.bf16.msra.mxu2 %v2174_v34  ;;  %1010 = vmatpush.bf16.msra.mxu3 %v2177_v38 }
 0x23f   :  { %972 = vmatpush.bf16.msra.mxu0 %v2179_v39  ;;  %985 = vmatpush.bf16.msra.mxu1 %v2183_v43 }
 0x240   :  { %998 = vmatpush.bf16.msra.mxu2 %v2189_v49  ;;  %1011 = vmatpush.bf16.msra.mxu3 %v2193_v52 }
 0x243   :  { %973 = vmatpush.bf16.msra.mxu0 %v2195_v53  ;;  %986 = vmatpush.bf16.msra.mxu1 %v2198_v57 }
 0x244   :  { %999 = vmatpush.bf16.msra.mxu2 %v2201_v63  ;;  %1012 = vmatpush.bf16.msra.mxu3 %v2205_v0 }
 0x247   :  { %974 = vmatpush.bf16.msra.mxu0 %v2207_v1  ;;  %987 = vmatpush.bf16.msra.mxu1 %v2210_v5 }
 0x248   :  { %1000 = vmatpush.bf16.msra.mxu2 %v2216_v12  ;;  %1013 = vmatpush.bf16.msra.mxu3 %v2220_v15 }
 0x24b   :  { %975 = vmatpush.bf16.msra.mxu0 %v2222_v16  ;;  %988 = vmatpush.bf16.msra.mxu1 %v2225_v20 }
 0x24c   :  { %1001 = vmatpush.bf16.msra.mxu2 %v2228_v24  ;;  %1014 = vmatpush.bf16.msra.mxu3 %v2232_v25 }
 0x24f   :  { %976 = vmatpush.bf16.msra.mxu0 %v2234_v26  ;;  %989 = vmatpush.bf16.msra.mxu1 %v2238_v31 }
 0x250   :  { %1002 = vmatpush.bf16.msra.mxu2 %v2244_v35  ;;  %1015 = vmatpush.bf16.msra.mxu3 %v2248_v41 }
 0x253   :  { %977 = vmatpush.bf16.msra.mxu0 %v2250_v42  ;;  %990 = vmatpush.bf16.msra.mxu1 %v2253_v47 }
 0x254   :  { %1003 = vmatpush.bf16.msra.mxu2 %v2256_v58  ;;  %1016 = vmatpush.bf16.msra.mxu3 %v2260_v59 }
 0x257   :  { %978 = vmatpush.bf16.msra.mxu0 %v2262_v60  ;;  %991 = vmatpush.bf16.msra.mxu1 %v2265_v2 }
 0x258   :  { %1004 = vmatpush.bf16.msra.mxu2 %v2268_v6  ;;  %1017 = vmatpush.bf16.msra.mxu3 %v2272_v7 }
 0x2b6   :  { %v816_v46 = vpop.f32.mrf.mxu0  ;;  %v829_v11 = vpop.f32.mrf.mxu1 }
 0x2b7   :  { %v859_v21 = vadd.f32 %v816_v46, %v2711_v8  ;;  %v860_v51 = vadd.f32 %v829_v11, %v2712_v9 }
 0x2b9   :  { %v863_v14 = vmul.f32 0.5, %v859_v21  ;;  %v864_v3 = vmul.f32 0.5, %v860_v51  ;;  %v2715_v51 = vld [vmem:[#allocation21_spill] sm:$0xff] }
 0x2bb   :  { %1884 = vtanh.f32 %v863_v14 }
 0x2bc   :  { %1886 = vtanh.f32 %v864_v3  ;;  %v2716_v3 = vld [vmem:[#allocation22_spill] sm:$0xff] }
 0x2bd   :  { %v842_v18 = vpop.f32.mrf.mxu2  ;;  %v855_v22 = vpop.f32.mrf.mxu3 }
 0x2be   :  { %v861_v28 = vadd.f32 %v842_v18, %v2713_v19  ;;  %v862_v23 = vadd.f32 %v855_v22, %v2714_v17  ;;  %v818_v10 = vpop.f32.mrf.mxu0  ;;  %v831_v56 = vpop.f32.mrf.mxu1 }
 0x2bf   :  { %v2718_v56 = vld [vmem:[#allocation24_spill] sm:$0xff] }
 0x2c0   :  { %1888 = vtanh.f32 %v861_v28  ;;  %v872_v13 = vmul.f32 0.5, %v862_v23  ;;  %v2717_v23 = vld [vmem:[#allocation23_spill] sm:$0xff] }
 0x2c1   :  { %v1885_v37 = vpop.eup %1884 }
 0x2c2   :  { %v1887_v44 = vpop.eup %1886  ;;  %v867_v61 = vadd.f32 1.0, %v1885_v37  ;;  %1890 = vtanh.f32 %v872_v13 }
 0x2c3   :  { %v868_v32 = vadd.f32 1.0, %v1887_v44 }
 0x2c4   :  { %v869_v27 = vmul.f32 0.5, %v867_v61 }
 0x2c5   :  { %v870_v45 = vmul.f32 0.5, %v868_v32  ;;  %v844_v55 = vpop.f32.mrf.mxu2  ;;  %v857_v4 = vpop.f32.mrf.mxu3 }
 0x2c6   :  { %v1889_v48 = vpop.eup %1888 }
 0x2c7   :  { %v876_v54 = vmul.f32 %v870_v45, %v2540_v36  ;;  %v877_v62 = vmul.f32 %v1889_v48, %v869_v27 }
 0x2c8   :  { %v1891_v40 = vpop.eup %1890 }
 0x2c9   :  { %v2580_v33 = vadd.f32 %v877_v62, %v876_v54  ;;  %v874_v50 = vadd.f32 1.0, %v1891_v40 }
 0x2cb   :  { %1892 = vtanh.f32 %v2580_v33  ;;  %v875_v46 = vmul.f32 0.5, %v874_v50 }
 0x2d1   :  { %v1893_v11 = vpop.eup %1892 }
 0x2d2   :  { %v880_v8 = vmul.f32 %v1893_v11, %v875_v46 }
 0x2d4   :  { %v888_v21 = vpack.c.bf16 %v880_v8, %v880_v8 }
 0x2d6   :  { %897 = vmatmul.bf16.vlgmr.msrb.gmra.mxu0 %v888_v21  ;;  %910 = vmatmul.bf16.vlgmr.msrb.gmra.mxu1 %v888_v21 }
 0x2d7   :  { %923 = vmatmul.bf16.vlgmr.msrb.gmra.mxu2 %v888_v21  ;;  %936 = vmatmul.bf16.vlgmr.msrb.gmra.mxu3 %v888_v21 }
 0x2d8   :  { %1053 = vmatpush.bf16.msrb.mxu0 %v2170_v29  ;;  %1066 = vmatpush.bf16.msrb.mxu1 %v2172_v30 }
 0x2d9   :  { %1079 = vmatpush.bf16.msrb.mxu2 %v2174_v34  ;;  %1092 = vmatpush.bf16.msrb.mxu3 %v2177_v38 }
 0x2dc   :  { %1054 = vmatpush.bf16.msrb.mxu0 %v2179_v39  ;;  %1067 = vmatpush.bf16.msrb.mxu1 %v2183_v43 }
 0x2dd   :  { %1080 = vmatpush.bf16.msrb.mxu2 %v2189_v49  ;;  %1093 = vmatpush.bf16.msrb.mxu3 %v2193_v52 }
 0x2e0   :  { %1055 = vmatpush.bf16.msrb.mxu0 %v2195_v53  ;;  %1068 = vmatpush.bf16.msrb.mxu1 %v2198_v57 }
 0x2e1   :  { %1081 = vmatpush.bf16.msrb.mxu2 %v2201_v63  ;;  %1094 = vmatpush.bf16.msrb.mxu3 %v2205_v0 }
 0x2e4   :  { %1056 = vmatpush.bf16.msrb.mxu0 %v2207_v1  ;;  %1069 = vmatpush.bf16.msrb.mxu1 %v2210_v5 }
 0x2e5   :  { %1082 = vmatpush.bf16.msrb.mxu2 %v2216_v12  ;;  %1095 = vmatpush.bf16.msrb.mxu3 %v2220_v15 }
 0x2e8   :  { %1057 = vmatpush.bf16.msrb.mxu0 %v2222_v16  ;;  %1070 = vmatpush.bf16.msrb.mxu1 %v2225_v20 }
 0x2e9   :  { %1083 = vmatpush.bf16.msrb.mxu2 %v2228_v24  ;;  %1096 = vmatpush.bf16.msrb.mxu3 %v2232_v25 }
 0x2ec   :  { %1058 = vmatpush.bf16.msrb.mxu0 %v2234_v26  ;;  %1071 = vmatpush.bf16.msrb.mxu1 %v2238_v31 }
 0x2ed   :  { %1084 = vmatpush.bf16.msrb.mxu2 %v2244_v35  ;;  %1097 = vmatpush.bf16.msrb.mxu3 %v2248_v41 }
 0x2f0   :  { %1059 = vmatpush.bf16.msrb.mxu0 %v2250_v42  ;;  %1072 = vmatpush.bf16.msrb.mxu1 %v2253_v47 }
 0x2f1   :  { %1085 = vmatpush.bf16.msrb.mxu2 %v2256_v58  ;;  %1098 = vmatpush.bf16.msrb.mxu3 %v2260_v59 }
 0x2f4   :  { %1060 = vmatpush.bf16.msrb.mxu0 %v2262_v60  ;;  %1073 = vmatpush.bf16.msrb.mxu1 %v2265_v2 }
 0x2f5   :  { %1086 = vmatpush.bf16.msrb.mxu2 %v2268_v6  ;;  %1099 = vmatpush.bf16.msrb.mxu3 %v2272_v7 }
 0x353   :  { %v898_v36 = vpop.f32.mrf.mxu0  ;;  %v911_v9 = vpop.f32.mrf.mxu1 }
 0x354   :  { %v941_v14 = vadd.f32 %v898_v36, %v2715_v51  ;;  %v942_v18 = vadd.f32 %v911_v9, %v2716_v3 }
 0x356   :  { %v945_v22 = vmul.f32 0.5, %v941_v14  ;;  %v946_v19 = vmul.f32 0.5, %v942_v18 }
 0x358   :  { %1894 = vtanh.f32 %v945_v22 }
 0x359   :  { %1896 = vtanh.f32 %v946_v19 }
 0x35a   :  { %v924_v28 = vpop.f32.mrf.mxu2  ;;  %v937_v17 = vpop.f32.mrf.mxu3 }
 0x35b   :  { %v943_v10 = vadd.f32 %v924_v28, %v2717_v23  ;;  %v944_v13 = vadd.f32 %v937_v17, %v2718_v56  ;;  %v900_v37 = vpop.f32.mrf.mxu0  ;;  %v913_v44 = vpop.f32.mrf.mxu1  ;;  %v2723_v28 = vld [vmem:[#allocation29_spill] sm:$0xff]  ;;  %v2724_v23 = vld [vmem:[#allocation30_spill] sm:$0xff] }
 0x35d   :  { %1898 = vtanh.f32 %v943_v10  ;;  %v954_v61 = vmul.f32 0.5, %v944_v13 }
 0x35e   :  { %v1895_v32 = vpop.eup %1894 }
 0x35f   :  { %v1897_v27 = vpop.eup %1896  ;;  %v949_v45 = vadd.f32 1.0, %v1895_v32  ;;  %1900 = vtanh.f32 %v954_v61  ;;  %v2725_v61 = vld [vmem:[#allocation31_spill] sm:$0xff] }
 0x360   :  { %v950_v55 = vadd.f32 1.0, %v1897_v27  ;;  %v2726_v27 = vld [vmem:[#allocation32_spill] sm:$0xff] }
 0x361   :  { %v951_v4 = vmul.f32 0.5, %v949_v45 }
 0x362   :  { %v952_v48 = vmul.f32 0.5, %v950_v55  ;;  %v926_v54 = vpop.f32.mrf.mxu2  ;;  %v939_v62 = vpop.f32.mrf.mxu3 }
 0x363   :  { %v1899_v40 = vpop.eup %1898 }
 0x364   :  { %v958_v50 = vmul.f32 %v952_v48, %v2580_v33  ;;  %v959_v46 = vmul.f32 %v1899_v40, %v951_v4 }
 0x365   :  { %v1901_v11 = vpop.eup %1900 }
 0x366   :  { %v2620_v8 = vadd.f32 %v959_v46, %v958_v50  ;;  %v956_v21 = vadd.f32 1.0, %v1901_v11 }
 0x368   :  { %1902 = vtanh.f32 %v2620_v8  ;;  %v957_v36 = vmul.f32 0.5, %v956_v21 }
 0x36e   :  { %v1903_v9 = vpop.eup %1902 }
 0x36f   :  { %v962_v51 = vmul.f32 %v1903_v9, %v957_v36 }
 0x371   :  { %v970_v14 = vpack.c.bf16 %v962_v51, %v962_v51 }
 0x373   :  { %979 = vmatmul.bf16.vlgmr.msra.gmra.mxu0 %v970_v14  ;;  %992 = vmatmul.bf16.vlgmr.msra.gmra.mxu1 %v970_v14 }
 0x374   :  { %1005 = vmatmul.bf16.vlgmr.msra.gmra.mxu2 %v970_v14  ;;  %1018 = vmatmul.bf16.vlgmr.msra.gmra.mxu3 %v970_v14 }
 0x375   :  { %1135 = vmatpush.bf16.msra.mxu0 %v2170_v29  ;;  %1148 = vmatpush.bf16.msra.mxu1 %v2172_v30 }
 0x376   :  { %1161 = vmatpush.bf16.msra.mxu2 %v2174_v34  ;;  %1174 = vmatpush.bf16.msra.mxu3 %v2177_v38  ;;  %v2719_v34 = vld [vmem:[#allocation25_spill] sm:$0xff] }
 0x379   :  { %1136 = vmatpush.bf16.msra.mxu0 %v2179_v39  ;;  %1149 = vmatpush.bf16.msra.mxu1 %v2183_v43  ;;  %v2720_v39 = vld [vmem:[#allocation26_spill] sm:$0xff] }
 0x37a   :  { %1162 = vmatpush.bf16.msra.mxu2 %v2189_v49  ;;  %1175 = vmatpush.bf16.msra.mxu3 %v2193_v52 }
 0x37d   :  { %1137 = vmatpush.bf16.msra.mxu0 %v2195_v53  ;;  %1150 = vmatpush.bf16.msra.mxu1 %v2198_v57 }
 0x37e   :  { %1163 = vmatpush.bf16.msra.mxu2 %v2201_v63  ;;  %1176 = vmatpush.bf16.msra.mxu3 %v2205_v0  ;;  %v2721_v63 = vld [vmem:[#allocation27_spill] sm:$0xff] }
 0x381   :  { %1138 = vmatpush.bf16.msra.mxu0 %v2207_v1  ;;  %1151 = vmatpush.bf16.msra.mxu1 %v2210_v5  ;;  %v2722_v1 = vld [vmem:[#allocation28_spill] sm:$0xff] }
 0x382   :  { %1164 = vmatpush.bf16.msra.mxu2 %v2216_v12  ;;  %1177 = vmatpush.bf16.msra.mxu3 %v2220_v15 }
 0x385   :  { %1139 = vmatpush.bf16.msra.mxu0 %v2222_v16  ;;  %1152 = vmatpush.bf16.msra.mxu1 %v2225_v20 }
 0x386   :  { %1165 = vmatpush.bf16.msra.mxu2 %v2228_v24  ;;  %1178 = vmatpush.bf16.msra.mxu3 %v2232_v25 }
 0x389   :  { %1140 = vmatpush.bf16.msra.mxu0 %v2234_v26  ;;  %1153 = vmatpush.bf16.msra.mxu1 %v2238_v31 }
 0x38a   :  { %1166 = vmatpush.bf16.msra.mxu2 %v2244_v35  ;;  %1179 = vmatpush.bf16.msra.mxu3 %v2248_v41 }
 0x38d   :  { %1141 = vmatpush.bf16.msra.mxu0 %v2250_v42  ;;  %1154 = vmatpush.bf16.msra.mxu1 %v2253_v47 }
 0x38e   :  { %1167 = vmatpush.bf16.msra.mxu2 %v2256_v58  ;;  %1180 = vmatpush.bf16.msra.mxu3 %v2260_v59 }
 0x391   :  { %1142 = vmatpush.bf16.msra.mxu0 %v2262_v60  ;;  %1155 = vmatpush.bf16.msra.mxu1 %v2265_v2 }
 0x392   :  { %1168 = vmatpush.bf16.msra.mxu2 %v2268_v6  ;;  %1181 = vmatpush.bf16.msra.mxu3 %v2272_v7 }
 0x3f0   :  { %v980_v29 = vpop.f32.mrf.mxu0  ;;  %v993_v30 = vpop.f32.mrf.mxu1 }
 0x3f1   :  { %v1023_v38 = vadd.f32 %v980_v29, %v2719_v34  ;;  %v1024_v43 = vadd.f32 %v993_v30, %v2720_v39 }
 0x3f3   :  { %v1027_v49 = vmul.f32 0.5, %v1023_v38  ;;  %v1028_v52 = vmul.f32 0.5, %v1024_v43 }
 0x3f5   :  { %1904 = vtanh.f32 %v1027_v49  ;;  %v1823_v49 = vld [vmem:[#allocation8 + $0x38] sm:$0xff] }
 0x3f6   :  { %1906 = vtanh.f32 %v1028_v52  ;;  %v1822_v52 = vld [vmem:[#allocation8 + $0x30] sm:$0xff] }
 0x3f7   :  { %v1006_v53 = vpop.f32.mrf.mxu2  ;;  %v1019_v57 = vpop.f32.mrf.mxu3 }
 0x3f8   :  { %v1025_v0 = vadd.f32 %v1006_v53, %v2721_v63  ;;  %v1026_v5 = vadd.f32 %v1019_v57, %v2722_v1  ;;  %v982_v12 = vpop.f32.mrf.mxu0  ;;  %v995_v15 = vpop.f32.mrf.mxu1  ;;  %v1821_v53 = vld [vmem:[#allocation8 + $0x28] sm:$0xff]  ;;  %v1820_v57 = vld [vmem:[#allocation8 + $0x20] sm:$0xff]  ;;  %v1819_v63 = vld [vmem:[#allocation8 + $0x18] sm:$0xff] }
 0x3f9   :  { %v1817_v1 = vld [vmem:[#allocation8 + $0x8] sm:$0xff] }
 0x3fa   :  { %1908 = vtanh.f32 %v1025_v0  ;;  %v1036_v16 = vmul.f32 0.5, %v1026_v5  ;;  %v1818_v0 = vld [vmem:[#allocation8 + $0x10] sm:$0xff]  ;;  %v1816_v5 = vld [vmem:[#allocation8] sm:$0xff] }
 0x3fb   :  { %v1905_v20 = vpop.eup %1904 }
 0x3fc   :  { %v1907_v24 = vpop.eup %1906  ;;  %v1031_v25 = vadd.f32 1.0, %v1905_v20  ;;  %1910 = vtanh.f32 %v1036_v16  ;;  %v1831_v16 = vld [vmem:[#allocation9 + $0x38] sm:$0xff]  ;;  %v2727_v20 = vld [vmem:[#allocation33_spill] sm:$0xff] }
 0x3fd   :  { %v1032_v26 = vadd.f32 1.0, %v1907_v24 }
 0x3fe   :  { %v1033_v31 = vmul.f32 0.5, %v1031_v25  ;;  %v2728_v25 = vld [vmem:[#allocation34_spill] sm:$0xff] }
 0x3ff   :  { %v1034_v35 = vmul.f32 0.5, %v1032_v26  ;;  %v1008_v41 = vpop.f32.mrf.mxu2  ;;  %v1021_v42 = vpop.f32.mrf.mxu3 }
 0x400   :  { %v1909_v47 = vpop.eup %1908  ;;  %v1829_v42 = vld [vmem:[#allocation9 + $0x28] sm:$0xff] }
 0x401   :  { %v1040_v58 = vmul.f32 %v1034_v35, %v2620_v8  ;;  %v1041_v59 = vmul.f32 %v1909_v47, %v1033_v31  ;;  %v1830_v31 = vld [vmem:[#allocation9 + $0x30] sm:$0xff] }
 0x402   :  { %v1911_v60 = vpop.eup %1910 }
 0x403   :  { %v1042_v2 = vadd.f32 %v1041_v59, %v1040_v58  ;;  %v1038_v6 = vadd.f32 1.0, %v1911_v60  ;;  %v2729_v59 = vld [vmem:[#allocation35_spill] sm:$0xff] }
 0x405   :  { %1912 = vtanh.f32 %v1042_v2  ;;  %v1039_v7 = vmul.f32 0.5, %v1038_v6 }
 0x40b   :  { %v1913_v33 = vpop.eup %1912 }
 0x40c   :  { %v1044_v3 = vmul.f32 %v1913_v33, %v1039_v7 }
 0x40e   :  { %v1052_v18 = vpack.c.bf16 %v1044_v3, %v1044_v3 }
 0x410   :  { %1061 = vmatmul.bf16.vlgmr.msrb.gmra.mxu0 %v1052_v18  ;;  %1074 = vmatmul.bf16.vlgmr.msrb.gmra.mxu1 %v1052_v18 }
 0x411   :  { %1087 = vmatmul.bf16.vlgmr.msrb.gmra.mxu2 %v1052_v18  ;;  %1100 = vmatmul.bf16.vlgmr.msrb.gmra.mxu3 %v1052_v18  ;;  %v1828_v18 = vld [vmem:[#allocation9 + $0x20] sm:$0xff] }
 0x412   :  { %1278 = vmatpush.bf16.msrb.mxu0 %v1823_v49  ;;  %1361 = vmatpush.bf16.msrb.mxu1 %v1831_v16  ;;  %v1832_v49 = vld [vmem:[#allocation11] sm:$0xff] }
 0x416   :  { %1279 = vmatpush.bf16.msrb.mxu0 %v1822_v52  ;;  %1362 = vmatpush.bf16.msrb.mxu1 %v1830_v31  ;;  %v1852_v52 = vld [vmem:[%s2687_s7] ss:$0 sm:$0xff] }
 0x41a   :  { %1280 = vmatpush.bf16.msrb.mxu0 %v1821_v53  ;;  %1363 = vmatpush.bf16.msrb.mxu1 %v1829_v42 }
 0x41e   :  { %1281 = vmatpush.bf16.msrb.mxu0 %v1820_v57  ;;  %1364 = vmatpush.bf16.msrb.mxu1 %v1828_v18 }
 0x422   :  { %1282 = vmatpush.bf16.msrb.mxu0 %v1819_v63 }
 0x426   :  { %1283 = vmatpush.bf16.msrb.mxu0 %v1818_v0 }
 0x42a   :  { %1284 = vmatpush.bf16.msrb.mxu0 %v1817_v1 }
 0x42e   :  { %1285 = vmatpush.bf16.msrb.mxu0 %v1816_v5  ;;  %v1853_v5 = vld [vmem:[%s2689_s9] ss:$0 sm:$0xff] }
 0x48d   :  { %v1062_v22 = vpop.f32.mrf.mxu0  ;;  %v1075_v19 = vpop.f32.mrf.mxu1 }
 0x48e   :  { %v1105_v17 = vadd.f32 %v1062_v22, %v2723_v28  ;;  %v1106_v10 = vadd.f32 %v1075_v19, %v2724_v23 }
 0x490   :  { %v1109_v56 = vmul.f32 0.5, %v1105_v17  ;;  %v1110_v13 = vmul.f32 0.5, %v1106_v10  ;;  %v1827_v10 = vld [vmem:[#allocation9 + $0x18] sm:$0xff] }
 0x491   :  { %1365 = vmatpush.bf16.msrb.mxu1 %v1827_v10 }
 0x492   :  { %1914 = vtanh.f32 %v1109_v56 }
 0x493   :  { %1916 = vtanh.f32 %v1110_v13 }
 0x494   :  { %v1088_v37 = vpop.f32.mrf.mxu2  ;;  %v1101_v44 = vpop.f32.mrf.mxu3 }
 0x495   :  { %v1107_v32 = vadd.f32 %v1088_v37, %v2725_v61  ;;  %v1108_v45 = vadd.f32 %v1101_v44, %v2726_v27  ;;  %v1064_v55 = vpop.f32.mrf.mxu0  ;;  %v1077_v4 = vpop.f32.mrf.mxu1  ;;  %v1826_v27 = vld [vmem:[#allocation9 + $0x10] sm:$0xff] }
 0x496   :  { %1366 = vmatpush.bf16.msrb.mxu1 %v1826_v27 }
 0x497   :  { %1918 = vtanh.f32 %v1107_v32  ;;  %v1118_v48 = vmul.f32 0.5, %v1108_v45 }
 0x498   :  { %v1915_v54 = vpop.eup %1914 }
 0x499   :  { %v1917_v62 = vpop.eup %1916  ;;  %v1113_v40 = vadd.f32 1.0, %v1915_v54  ;;  %1920 = vtanh.f32 %v1118_v48 }
 0x49a   :  { %v1114_v50 = vadd.f32 1.0, %v1917_v62 }
 0x49b   :  { %v1115_v46 = vmul.f32 0.5, %v1113_v40 }
 0x49c   :  { %v1116_v11 = vmul.f32 0.5, %v1114_v50  ;;  %v1090_v8 = vpop.f32.mrf.mxu2  ;;  %v1103_v21 = vpop.f32.mrf.mxu3  ;;  %v1825_v50 = vld [vmem:[#allocation9 + $0x8] sm:$0xff] }
 0x49d   :  { %v1919_v36 = vpop.eup %1918  ;;  %1367 = vmatpush.bf16.msrb.mxu1 %v1825_v50  ;;  %v1838_v8 = vld [vmem:[#allocation11 + $0x30] sm:$0xff]  ;;  %v1837_v21 = vld [vmem:[#allocation11 + $0x28] sm:$0xff] }
 0x49e   :  { %v1122_v9 = vmul.f32 %v1116_v11, %v1042_v2  ;;  %v1123_v51 = vmul.f32 %v1919_v36, %v1115_v46  ;;  %v2730_v2 = vld [vmem:[#allocation36_spill] sm:$0xff]  ;;  %v1839_v11 = vld [vmem:[#allocation11 + $0x38] sm:$0xff] }
 0x49f   :  { %v1921_v14 = vpop.eup %1920  ;;  %v1824_v46 = vld [vmem:[#allocation9] sm:$0xff]  ;;  %1444 = vmatpush.bf16.msrb.mxu2 %v1839_v11 }
 0x4a0   :  { %v1124_v29 = vadd.f32 %v1123_v51, %v1122_v9  ;;  %v1120_v30 = vadd.f32 1.0, %v1921_v14  ;;  %v1836_v36 = vld [vmem:[#allocation11 + $0x20] sm:$0xff]  ;;  %v1835_v9 = vld [vmem:[#allocation11 + $0x18] sm:$0xff]  ;;  %v1834_v51 = vld [vmem:[#allocation11 + $0x10] sm:$0xff] }
 0x4a1   :  { %1368 = vmatpush.bf16.msrb.mxu1 %v1824_v46  ;;  %v1851_v14 = vld [vmem:[%s2685_s5] ss:$0 sm:$0xff] }
 0x4a2   :  { %1922 = vtanh.f32 %v1124_v29  ;;  %v1121_v34 = vmul.f32 0.5, %v1120_v30 }
 0x4a3   :  { %1445 = vmatpush.bf16.msrb.mxu2 %v1838_v8 }
 0x4a7   :  { %1446 = vmatpush.bf16.msrb.mxu2 %v1837_v21 }
 0x4a8   :  { %v1923_v38 = vpop.eup %1922 }
 0x4a9   :  { %v1126_v39 = vmul.f32 %v1923_v38, %v1121_v34 }
 0x4ab   :  { %v1134_v43 = vpack.c.bf16 %v1126_v39, %v1126_v39  ;;  %1447 = vmatpush.bf16.msrb.mxu2 %v1836_v36 }
 0x4ad   :  { %1143 = vmatmul.bf16.vlgmr.msra.gmra.mxu0 %v1134_v43  ;;  %1156 = vmatmul.bf16.vlgmr.msra.gmra.mxu1 %v1134_v43 }
 0x4ae   :  { %1169 = vmatmul.bf16.vlgmr.msra.gmra.mxu2 %v1134_v43  ;;  %1182 = vmatmul.bf16.vlgmr.msra.gmra.mxu3 %v1134_v43  ;;  %v1833_v43 = vld [vmem:[#allocation11 + $0x8] sm:$0xff] }
 0x4af   :  { %1448 = vmatpush.bf16.msrb.mxu2 %v1835_v9 }
 0x4b3   :  { %1449 = vmatpush.bf16.msrb.mxu2 %v1834_v51 }
 0x4b7   :  { %1450 = vmatpush.bf16.msrb.mxu2 %v1833_v43 }
 0x4bb   :  { %1451 = vmatpush.bf16.msrb.mxu2 %v1832_v49 }
 0x52a   :  { %v1144_v12 = vpop.f32.mrf.mxu0  ;;  %v1157_v15 = vpop.f32.mrf.mxu1 }
 0x52b   :  { %v1187_v24 = vadd.f32 %v1144_v12, %v2727_v20  ;;  %v1188_v26 = vadd.f32 %v1157_v15, %v2728_v25 }
 0x52d   :  { %v1191_v35 = vmul.f32 0.5, %v1187_v24  ;;  %v1192_v41 = vmul.f32 0.5, %v1188_v26 }
 0x52f   :  { %1924 = vtanh.f32 %v1191_v35 }
 0x530   :  { %1926 = vtanh.f32 %v1192_v41 }
 0x531   :  { %v1170_v47 = vpop.f32.mrf.mxu2  ;;  %v1183_v58 = vpop.f32.mrf.mxu3 }
 0x532   :  { %v1189_v60 = vadd.f32 %v1170_v47, %v2729_v59  ;;  %v1190_v6 = vadd.f32 %v1183_v58, %v2730_v2  ;;  %v1146_v7 = vpop.f32.mrf.mxu0  ;;  %v1159_v33 = vpop.f32.mrf.mxu1 }
 0x534   :  { %1928 = vtanh.f32 %v1189_v60  ;;  %v1200_v3 = vmul.f32 0.5, %v1190_v6 }
 0x535   :  { %v1925_v22 = vpop.eup %1924 }
 0x536   :  { %v1927_v19 = vpop.eup %1926  ;;  %v1195_v28 = vadd.f32 1.0, %v1925_v22  ;;  %1930 = vtanh.f32 %v1200_v3 }
 0x537   :  { %v1196_v17 = vadd.f32 1.0, %v1927_v19 }
 0x538   :  { %v1197_v23 = vmul.f32 0.5, %v1195_v28 }
 0x539   :  { %v1198_v56 = vmul.f32 0.5, %v1196_v17  ;;  %v1172_v13 = vpop.f32.mrf.mxu2  ;;  %v1185_v37 = vpop.f32.mrf.mxu3 }
 0x53a   :  { %v1929_v44 = vpop.eup %1928 }
 0x53b   :  { %v1204_v61 = vmul.f32 %v1198_v56, %v1124_v29  ;;  %v1205_v32 = vmul.f32 %v1929_v44, %v1197_v23 }
 0x53c   :  { %v1931_v45 = vpop.eup %1930 }
 0x53d   :  { %v1206_v55 = vadd.f32 %v1205_v32, %v1204_v61  ;;  %v1202_v4 = vadd.f32 1.0, %v1931_v45 }
 0x53f   :  { %1932 = vtanh.f32 %v1206_v55  ;;  %v1203_v48 = vmul.f32 0.5, %v1202_v4 }
 0x545   :  { %v1933_v54 = vpop.eup %1932 }
 0x546   :  { %v1208_v62 = vmul.f32 %v1933_v54, %v1203_v48 }
 0x548   :  { %v1209_v40 = vpack.c.bf16 %v1208_v62, %v1208_v62 }
 0x54a   :  { %1286 = vmatmul.bf16.vlgmr.msrb.gmra.mxu0 %v1209_v40 }
 0x5c7   :  { %v1287_v29 = vpop.f32.mrf.mxu0 }
 0x5c8   :  { %v1288_v30 = vadd.f32 %v1851_v14, %v1287_v29 }
 0x5ca   :  { %v1291_v34 = vmax.f32 %v1288_v30, 0.0 }
 0x5cc   :  { %v1292_v38 = vpack.c.bf16 %v1291_v34, %v1291_v34 }
 0x5ce   :  { %1369 = vmatmul.bf16.vlgmr.msrb.gmra.mxu1 %v1292_v38 }
 0x5cf   :  { %v1289_v39 = vpop.f32.mrf.mxu0 }
 0x64b   :  { %v1370_v53 = vpop.f32.mrf.mxu1 }
 0x64c   :  { %v1371_v57 = vadd.f32 %v1852_v52, %v1370_v53 }
 0x64e   :  { %v1374_v63 = vmax.f32 %v1371_v57, 0.0 }
 0x650   :  { %v1375_v0 = vpack.c.bf16 %v1374_v63, %v1374_v63 }
 0x652   :  { %1452 = vmatmul.bf16.vlgmr.msrb.gmra.mxu2 %v1375_v0 }
 0x653   :  { %v1372_v1 = vpop.f32.mrf.mxu1 }
 0x6d5   :  { %v1453_v12 = vpop.f32.mrf.mxu2 }
 0x6d6   :  { %v1454_v15 = vadd.f32 %v1853_v5, %v1453_v12 }
 0x6d8   :  { %1457 = vst [vmem:[#allocation12] sm:$0xff] %v1454_v15 }
 0x6d9   :  { %1468 = dma.vmem_to_hbm [thread:$0]  %s1464_s30, 128, %s1466_s13, [#allocation5]  }
 0x6dd   :  { %v1455_v16 = vpop.f32.mrf.mxu2 }
 0x6de   :  { %2084 = dma.done.wait [#allocation5], 128  }
 0x6df   :  { %2085 = vsyncadd [#allocation5], 4294967168 }
 0x6e0   :  { %1473 = vsyncpa [#allocation4], 1 }
 0x6e1   :  { %1474 = vsyncpa [#allocation7], 1 }
 0x6e2   :  { %1475 = vsyncpa [#allocation10], 1 }
 0x6e3   :  { %1476 = vsyncpa [#allocation5], 1 }

</bundles_post_ra>
